<compile_context>
chip_gen: v7x
topology: tpu7x:2x2x1
jax: 0.10.0
libtpu: 0.0.40
codegen_flags: <defaults>
</compile_context>

<pallas_src>
import jax
import jax.numpy as jnp
from jax.experimental import pallas as pl
from jax.experimental.pallas import tpu as pltpu

IN_FEATURES = 50 * 4 * 4   # 800
HIDDEN = 500
HIDDEN_PAD = 512           # 500 -> 512 (multiple of 128 lanes)
OUT_FEATURES = 10
OUT_PAD = 128              # 10  -> 128 (lane-dense output stores)
BN_EPS = 1e-5
TB_DEFAULT = 128           # batch tile: multiple of 16 (bf16 sublane packing),
                           # 128-aligned for v5e MXU; sweep 256/512 on v6e/v7x.


def _predictor_kernel(x_ref, w1_ref, b1_ref, w2_ref, b2_ref, o_ref):
    # Linear 1 (BN pre-folded into w1/b1): bf16 MXU matmul, f32 accumulation.
    h = jnp.dot(x_ref[...], w1_ref[...], preferred_element_type=jnp.float32)
    h = jnp.maximum(h + b1_ref[...], 0.0)                      # (TB, 512) f32
    # Linear 2: cast activations to bf16 for the MXU, accumulate in f32.
    out = jnp.dot(h.astype(jnp.bfloat16), w2_ref[...],
                  preferred_element_type=jnp.float32)
    o_ref[...] = out + b2_ref[...]                             # (TB, 128) f32


def prepare_inference_params(params):
    """Fold BatchNorm into Linear1, zero-pad to TPU-friendly shapes, cast to bf16."""
    scale = params["gamma"] * jax.lax.rsqrt(params["running_var"] + BN_EPS)
    w1f = params["w1"] * scale                                           # (800, 500)
    b1f = (params["b1"] - params["running_mean"]) * scale + params["beta"]
    # Hidden pad 500 -> 512: padded columns are 0 (bias 0, ReLU(0)=0) and the
    # matching rows of W2 are 0, so the result is exact.
    w1p = jnp.pad(w1f, ((0, 0), (0, HIDDEN_PAD - HIDDEN)))
    b1p = jnp.pad(b1f, ((0, 0), (0, HIDDEN_PAD - HIDDEN)))
    # Output pad 10 -> 128: padded lanes are 0 and sliced off in the wrapper.
    w2p = jnp.pad(params["w2"],
                  ((0, HIDDEN_PAD - HIDDEN), (0, OUT_PAD - OUT_FEATURES)))
    b2p = jnp.pad(params["b2"], ((0, 0), (0, OUT_PAD - OUT_FEATURES)))
    return {
        "w1": w1p.astype(jnp.bfloat16),
        "b1": b1p.astype(jnp.float32),
        "w2": w2p.astype(jnp.bfloat16),
        "b2": b2p.astype(jnp.float32),
    }


def predictor_gray_forward(x, prep, tb=TB_DEFAULT):
    """x: (B, 800) float32 -> (B, 10) float32, using prepared params."""
    B = x.shape[0]
    n_tiles = pl.cdiv(B, tb)
    Bp = n_tiles * tb
    xp = jnp.zeros((Bp, IN_FEATURES), jnp.bfloat16)
    xp = xp.at[:B].set(x.astype(jnp.bfloat16))

    out = pl.pallas_call(
        _predictor_kernel,
        out_shape=jax.ShapeDtypeStruct((Bp, OUT_PAD), jnp.float32),
        grid=(n_tiles,),
        in_specs=[
            # x tile follows the batch grid; weights/biases stay resident.
            pl.BlockSpec((tb, IN_FEATURES), lambda i: (i, 0)),
            pl.BlockSpec((IN_FEATURES, HIDDEN_PAD), lambda i: (0, 0)),
            pl.BlockSpec((1, HIDDEN_PAD), lambda i: (0, 0)),
            pl.BlockSpec((HIDDEN_PAD, OUT_PAD), lambda i: (0, 0)),
            pl.BlockSpec((1, OUT_PAD), lambda i: (0, 0)),
        ],
        out_specs=pl.BlockSpec((tb, OUT_PAD), lambda i: (i, 0)),
        compiler_params=pltpu.CompilerParams(
            dimension_semantics=("parallel",)),
    )(xp, prep["w1"], prep["b1"], prep["w2"], prep["b2"])

    return out[:B, :OUT_FEATURES]


def init_params(key):
    """Deterministic init mirroring PyTorch defaults (uniform ±1/sqrt(fan_in))."""
    k1, k2, k3, k4 = jax.random.split(key, 4)
    bound1 = 1.0 / jnp.sqrt(jnp.float32(IN_FEATURES))
    bound2 = 1.0 / jnp.sqrt(jnp.float32(HIDDEN))
    return {
        # Stored as (in, out) so the kernel does x @ W directly.
        "w1": jax.random.uniform(k1, (IN_FEATURES, HIDDEN), jnp.float32,
                                 -bound1, bound1),
        "b1": jax.random.uniform(k2, (1, HIDDEN), jnp.float32, -bound1, bound1),
        "w2": jax.random.uniform(k3, (HIDDEN, OUT_FEATURES), jnp.float32,
                                 -bound2, bound2),
        "b2": jax.random.uniform(k4, (1, OUT_FEATURES), jnp.float32,
                                 -bound2, bound2),
        # BatchNorm1d(500) defaults: gamma=1, beta=0, running stats (0, 1).
        "gamma": jnp.ones((1, HIDDEN), jnp.float32),
        "beta": jnp.zeros((1, HIDDEN), jnp.float32),
        "running_mean": jnp.zeros((1, HIDDEN), jnp.float32),
        "running_var": jnp.ones((1, HIDDEN), jnp.float32),
    }


def _reference_forward(x, p):
    """Full-precision (f32) reference of the PyTorch eval-mode forward."""
    h = x @ p["w1"] + p["b1"]
    h = (h - p["running_mean"]) * jax.lax.rsqrt(p["running_var"] + BN_EPS) \
        * p["gamma"] + p["beta"]
    h = jnp.maximum(h, 0.0)
    return h @ p["w2"] + p["b2"]


if __name__ == "__main__":
    key = jax.random.PRNGKey(0)
    kx, kp = jax.random.split(key)

    B = 8
    x = jax.random.normal(kx, (B, IN_FEATURES), jnp.float32)
    params = init_params(kp)
    prep = prepare_inference_params(params)

    out = predictor_gray_forward(x, prep)
    out = jax.block_until_ready(out)

    ref = _reference_forward(x, params)
    assert out.shape == (B, OUT_FEATURES)
    # bf16 matmul inputs (f32 accumulation) -> loosened tolerance vs f32 ref.
    assert jnp.allclose(out, ref, atol=2e-2, rtol=2e-2), \
        float(jnp.max(jnp.abs(out - ref)))

    print("KERNEL_OK")
</pallas_src>

<mosaic_0001>
module attributes {stable_mosaic.version = 11 : i64} {
  func.func @_predictor_kernel(%arg0: i32, %arg1: memref<128x800xbf16, #tpu.memory_space<vmem>>, %arg2: memref<800x512xbf16, #tpu.memory_space<vmem>>, %arg3: memref<1x512xf32, #tpu.memory_space<vmem>>, %arg4: memref<512x128xbf16, #tpu.memory_space<vmem>>, %arg5: memref<1x128xf32, #tpu.memory_space<vmem>>, %arg6: memref<128x128xf32, #tpu.memory_space<vmem>>) attributes {dimension_semantics = [#tpu.dimension_semantics<parallel>], iteration_bounds = array<i64: 1>, scalar_prefetch = 0 : i64, scratch_operands = 0 : i64, tpu.core_type = #tpu.core_type<tc>, window_params = [{transform_indices = @transform_0, window_bounds = array<i64: 128, 800>}, {pipeline_mode = #tpu.pipeline_mode<synchronous>, transform_indices = @transform_1, window_bounds = array<i64: 800, 512>}, {pipeline_mode = #tpu.pipeline_mode<synchronous>, transform_indices = @transform_2, window_bounds = array<i64: 1, 512>}, {pipeline_mode = #tpu.pipeline_mode<synchronous>, transform_indices = @transform_3, window_bounds = array<i64: 512, 128>}, {pipeline_mode = #tpu.pipeline_mode<synchronous>, transform_indices = @transform_4, window_bounds = array<i64: 1, 128>}, {transform_indices = @transform_5, window_bounds = array<i64: 128, 128>}]} {
    %c0 = arith.constant 0 : index
    %c0_0 = arith.constant 0 : index
    %0 = vector.load %arg1[%c0, %c0_0] : memref<128x800xbf16, #tpu.memory_space<vmem>>, vector<128x800xbf16>
    %c0_1 = arith.constant 0 : index
    %c0_2 = arith.constant 0 : index
    %1 = vector.load %arg2[%c0_1, %c0_2] : memref<800x512xbf16, #tpu.memory_space<vmem>>, vector<800x512xbf16>
    %cst = arith.constant dense<0.000000e+00> : vector<128x512xf32>
    %2 = tpu.matmul %0, %1, %cst {dimension_numbers = #tpu.dot_dimension_numbers<[1], [0], [0], [1], [0, 0, 1, 1], [], []>} : vector<128x800xbf16>, vector<800x512xbf16>, vector<128x512xf32> -> vector<128x512xf32>
    %c0_3 = arith.constant 0 : index
    %c0_4 = arith.constant 0 : index
    %3 = vector.load %arg3[%c0_3, %c0_4] : memref<1x512xf32, #tpu.memory_space<vmem>>, vector<1x512xf32>
    %4 = vector.broadcast %3 : vector<1x512xf32> to vector<128x512xf32>
    %5 = arith.addf %2, %4 : vector<128x512xf32>
    %cst_5 = arith.constant 0.000000e+00 : f32
    %6 = vector.broadcast %cst_5 : f32 to vector<128x512xf32>
    %7 = arith.maximumf %5, %6 : vector<128x512xf32>
    %8 = arith.truncf %7 : vector<128x512xf32> to vector<128x512xbf16>
    %c0_6 = arith.constant 0 : index
    %c0_7 = arith.constant 0 : index
    %9 = vector.load %arg4[%c0_6, %c0_7] : memref<512x128xbf16, #tpu.memory_space<vmem>>, vector<512x128xbf16>
    %cst_8 = arith.constant dense<0.000000e+00> : vector<128x128xf32>
    %10 = tpu.matmul %8, %9, %cst_8 {dimension_numbers = #tpu.dot_dimension_numbers<[1], [0], [0], [1], [0, 0, 1, 1], [], []>} : vector<128x512xbf16>, vector<512x128xbf16>, vector<128x128xf32> -> vector<128x128xf32>
    %c0_9 = arith.constant 0 : index
    %c0_10 = arith.constant 0 : index
    %11 = vector.load %arg5[%c0_9, %c0_10] : memref<1x128xf32, #tpu.memory_space<vmem>>, vector<1x128xf32>
    %12 = vector.broadcast %11 : vector<1x128xf32> to vector<128x128xf32>
    %13 = arith.addf %10, %12 : vector<128x128xf32>
    %c0_11 = arith.constant 0 : index
    %c0_12 = arith.constant 0 : index
    %14 = vector.load %arg6[%c0_11, %c0_12] : memref<128x128xf32, #tpu.memory_space<vmem>>, vector<128x128xf32>
    tpu.vector_store %arg6[%c0_11, %c0_12], %13 {strides = array<i32>} : memref<128x128xf32, #tpu.memory_space<vmem>>, vector<128x128xf32>,
    return
  }
  func.func @transform_0(%arg0: i32) -> (i32, i32) {
    %c0_i32 = arith.constant 0 : i32
    %c0_i32_0 = arith.constant 0 : i32
    return %arg0, %c0_i32 : i32, i32
  }
  func.func @transform_1(%arg0: i32) -> (i32, i32) {
    %c0_i32 = arith.constant 0 : i32
    %c0_i32_0 = arith.constant 0 : i32
    %c0_i32_1 = arith.constant 0 : i32
    return %c0_i32, %c0_i32_0 : i32, i32
  }
  func.func @transform_2(%arg0: i32) -> (i32, i32) {
    %c0_i32 = arith.constant 0 : i32
    %c0_i32_0 = arith.constant 0 : i32
    %c0_i32_1 = arith.constant 0 : i32
    return %c0_i32, %c0_i32_0 : i32, i32
  }
  func.func @transform_3(%arg0: i32) -> (i32, i32) {
    %c0_i32 = arith.constant 0 : i32
    %c0_i32_0 = arith.constant 0 : i32
    %c0_i32_1 = arith.constant 0 : i32
    return %c0_i32, %c0_i32_0 : i32, i32
  }
  func.func @transform_4(%arg0: i32) -> (i32, i32) {
    %c0_i32 = arith.constant 0 : i32
    %c0_i32_0 = arith.constant 0 : i32
    %c0_i32_1 = arith.constant 0 : i32
    return %c0_i32, %c0_i32_0 : i32, i32
  }
  func.func @transform_5(%arg0: i32) -> (i32, i32) {
    %c0_i32 = arith.constant 0 : i32
    %c0_i32_0 = arith.constant 0 : i32
    return %arg0, %c0_i32 : i32, i32
  }
}

</mosaic_0001>

<bundles_post_ra>
// kernel: tpu_custom_call.1
= control target key start
LH: loop header
LB: loop body
LE: loop exit
PB: predicated region body
PF: predicated region fallthrough
CT: control target
= control target key end

     0   :  { %10 = vsyncpa [#allocation3], 0  ;;  %s4726_s0 = inlined_call_operand.vmem [shape: bf16[128,800], index: 0, kind: input, shape index: {}]   ;;  %s4727_s1 = inlined_call_operand.hbm [shape: bf16[800,512], index: 1, kind: input, shape index: {}]   ;;  %s4728_s2 = inlined_call_operand.vmem [shape: f32[1,512], index: 2, kind: input, shape index: {}]   ;;  %s4729_s3 = inlined_call_operand.vmem [shape: bf16[512,128], index: 3, kind: input, shape index: {}]   ;;  %s4730_s4 = inlined_call_operand.vmem [shape: f32[1,128], index: 4, kind: input, shape index: {}]   ;;  %s4731_s5 = inlined_call_operand.hbm [shape: f32[128,128], index: 5, kind: output, shape index: {}]  }
   0x1   :  { %11 = vsyncpa [#allocation4], 0  ;;  %s4273_s18 = smov [#allocation2]   ;;  %s4225_s22 = scalar_lea.hbm %s4727_s1, 25600 }
   0x2   :  { %s19_s19 = sshll.u32 %s4273_s18, 4  ;;  %p4226_p0 = scmp.ne.s32.totalorder %s4727_s1, %s4225_s22  ;;  %s20_s19 = int_to_ptr.vmem [resolvable:$true] %s19_s19 }
   0x3   :  { %p4229_p1 = scmp.lt.u32.totalorder %s4225_s22, %s4727_s1 }
   0x5   :  { %p4231_p2 = pnand %p4229_p1, %p4226_p0 }
   0x7   :  { %4234 = shalt.err (!%p4231_p2)
}
   0x8   :  { %s4235_s27 = scalar_lea.vmem %s20_s19, 25600  ;;  %p4240_p4 = scmp.lt.s32.totalorder %s20_s19, %s20_s19 }
   0x9   :  { %p4236_p3 = scmp.ne.s32.totalorder %s20_s19, %s4235_s27  ;;  %p4241_p5 = scmp.lt.s32.totalorder %s4235_s27, %s4235_s27 }
   0xb   :  { %p4242_p6 = por %p4241_p5, %p4240_p4 }
   0xd   :  { %p4243_p7 = pnand %p4242_p6, %p4236_p3 }
   0xf   :  { %4246 = shalt.err (!%p4243_p7)
}
  0x10   :  { %s4274_s28 = smov 256   ;;  %s4275_s29 = smov 16  }
  0x11   :  { %25 = dma.hbm_to_vmem [thread:$0]  %s4727_s1, 25600, %s20_s19, [#allocation3], %s4274_s28, %s4274_s28, %s4275_s29  }
  0x12   :  { %4269 = dma.done.wait [#allocation3], 25600  }
  0x13   :  { %4270 = vsyncadd [#allocation3], 4294941696  ;;  %v3813_v0 = vld [vmem:[#allocation2 + $0x4] ss:$16 sps:$4 sm:$0xff]   ;;  %v3815_v1 = vld [vmem:[#allocation2 + $0xc] ss:$16 sps:$4 sm:$0xff]  }
  0x14   :  { %1627 = vmatprep.subr.bf16.mxu0 %v3813_v0  ;;  %v3817_v2 = vld [vmem:[#allocation2] ss:$16 sps:$4 sm:$0xff]   ;;  %v3818_v3 = vld [vmem:[#allocation2 + $0x8] ss:$16 sps:$4 sm:$0xff]   ;;  %2079 = vmatprep.subr.bf16.mxu1 %v3815_v1  ;;  %v3819_v4 = vld [vmem:[#allocation2 + $0x24] ss:$16 sps:$4 sm:$0xff]  }
  0x15   :  { %1628 = vmatpush1.bf16.msra.mxu0 %v3817_v2  ;;  %2080 = vmatpush1.bf16.msra.mxu1 %v3818_v3  ;;  %v3821_v5 = vld [vmem:[#allocation2 + $0x2c] ss:$16 sps:$4 sm:$0xff]   ;;  %v3823_v6 = vld [vmem:[#allocation2 + $0x20] ss:$16 sps:$4 sm:$0xff]   ;;  %v3824_v7 = vld [vmem:[#allocation2 + $0x28] ss:$16 sps:$4 sm:$0xff]  }
  0x16   :  { %1629 = vmatprep.subr.bf16.mxu0 %v3819_v4  ;;  %2081 = vmatprep.subr.bf16.mxu1 %v3821_v5  ;;  %v3825_v8 = vld [vmem:[#allocation2 + $0x44] ss:$16 sps:$4 sm:$0xff]   ;;  %v3827_v9 = vld [vmem:[#allocation2 + $0x4c] ss:$16 sps:$4 sm:$0xff]   ;;  %v3829_v10 = vld [vmem:[#allocation2 + $0x40] ss:$16 sps:$4 sm:$0xff]  }
  0x17   :  { %v3830_v11 = vld [vmem:[#allocation2 + $0x48] ss:$16 sps:$4 sm:$0xff]   ;;  %v3831_v12 = vld [vmem:[#allocation2 + $0x64] ss:$16 sps:$4 sm:$0xff]   ;;  %v3833_v13 = vld [vmem:[#allocation2 + $0x6c] ss:$16 sps:$4 sm:$0xff]  }
  0x18   :  { %v3835_v14 = vld [vmem:[#allocation2 + $0x60] ss:$16 sps:$4 sm:$0xff]   ;;  %v3836_v15 = vld [vmem:[#allocation2 + $0x68] ss:$16 sps:$4 sm:$0xff]   ;;  %v3837_v16 = vld [vmem:[#allocation2 + $0x84] ss:$16 sps:$4 sm:$0xff]  }
  0x19   :  { %1630 = vmatpush1.bf16.msra.mxu0 %v3823_v6  ;;  %2082 = vmatpush1.bf16.msra.mxu1 %v3824_v7  ;;  %v3839_v17 = vld [vmem:[#allocation2 + $0x8c] ss:$16 sps:$4 sm:$0xff]   ;;  %v3841_v18 = vld [vmem:[#allocation2 + $0x80] ss:$16 sps:$4 sm:$0xff]   ;;  %v3842_v19 = vld [vmem:[#allocation2 + $0x88] ss:$16 sps:$4 sm:$0xff]  }
  0x1a   :  { %1631 = vmatprep.subr.bf16.mxu0 %v3825_v8  ;;  %2083 = vmatprep.subr.bf16.mxu1 %v3827_v9  ;;  %v3843_v20 = vld [vmem:[#allocation2 + $0xa4] ss:$16 sps:$4 sm:$0xff]   ;;  %v3845_v21 = vld [vmem:[#allocation2 + $0xac] ss:$16 sps:$4 sm:$0xff]   ;;  %v3847_v22 = vld [vmem:[#allocation2 + $0xa0] ss:$16 sps:$4 sm:$0xff]  }
  0x1b   :  { %v3848_v23 = vld [vmem:[#allocation2 + $0xa8] ss:$16 sps:$4 sm:$0xff]   ;;  %v3849_v24 = vld [vmem:[#allocation2 + $0xc4] ss:$16 sps:$4 sm:$0xff]   ;;  %v3851_v25 = vld [vmem:[#allocation2 + $0xcc] ss:$16 sps:$4 sm:$0xff]  }
  0x1c   :  { %v3853_v26 = vld [vmem:[#allocation2 + $0xc0] ss:$16 sps:$4 sm:$0xff]   ;;  %v3854_v27 = vld [vmem:[#allocation2 + $0xc8] ss:$16 sps:$4 sm:$0xff]   ;;  %v3855_v28 = vld [vmem:[#allocation2 + $0xe4] ss:$16 sps:$4 sm:$0xff]  }
  0x1d   :  { %1632 = vmatpush1.bf16.msra.mxu0 %v3829_v10  ;;  %2084 = vmatpush1.bf16.msra.mxu1 %v3830_v11  ;;  %v3857_v29 = vld [vmem:[#allocation2 + $0xec] ss:$16 sps:$4 sm:$0xff]   ;;  %v3859_v30 = vld [vmem:[#allocation2 + $0xe0] ss:$16 sps:$4 sm:$0xff]   ;;  %v3860_v31 = vld [vmem:[#allocation2 + $0xe8] ss:$16 sps:$4 sm:$0xff]  }
  0x1e   :  { %1633 = vmatprep.subr.bf16.mxu0 %v3831_v12  ;;  %2085 = vmatprep.subr.bf16.mxu1 %v3833_v13  ;;  %v3861_v32 = vld [vmem:[#allocation2 + $0x104] ss:$16 sps:$4 sm:$0xff]   ;;  %v3863_v33 = vld [vmem:[#allocation2 + $0x10c] ss:$16 sps:$4 sm:$0xff]   ;;  %v3865_v34 = vld [vmem:[#allocation2 + $0x100] ss:$16 sps:$4 sm:$0xff]  }
  0x1f   :  { %v3866_v35 = vld [vmem:[#allocation2 + $0x108] ss:$16 sps:$4 sm:$0xff]   ;;  %v3867_v36 = vld [vmem:[#allocation2 + $0x124] ss:$16 sps:$4 sm:$0xff]   ;;  %v3869_v37 = vld [vmem:[#allocation2 + $0x12c] ss:$16 sps:$4 sm:$0xff]  }
  0x20   :  { %v3871_v38 = vld [vmem:[#allocation2 + $0x120] ss:$16 sps:$4 sm:$0xff]   ;;  %v3872_v39 = vld [vmem:[#allocation2 + $0x128] ss:$16 sps:$4 sm:$0xff]   ;;  %v3873_v40 = vld [vmem:[#allocation2 + $0x144] ss:$16 sps:$4 sm:$0xff]  }
  0x21   :  { %1634 = vmatpush1.bf16.msra.mxu0 %v3835_v14  ;;  %2086 = vmatpush1.bf16.msra.mxu1 %v3836_v15  ;;  %v3875_v41 = vld [vmem:[#allocation2 + $0x14c] ss:$16 sps:$4 sm:$0xff]   ;;  %v3877_v42 = vld [vmem:[#allocation2 + $0x140] ss:$16 sps:$4 sm:$0xff]   ;;  %v3878_v43 = vld [vmem:[#allocation2 + $0x148] ss:$16 sps:$4 sm:$0xff]  }
  0x22   :  { %1635 = vmatprep.subr.bf16.mxu0 %v3837_v16  ;;  %2087 = vmatprep.subr.bf16.mxu1 %v3839_v17  ;;  %v3879_v44 = vld [vmem:[#allocation2 + $0x164] ss:$16 sps:$4 sm:$0xff]   ;;  %v3881_v45 = vld [vmem:[#allocation2 + $0x16c] ss:$16 sps:$4 sm:$0xff]   ;;  %v3883_v46 = vld [vmem:[#allocation2 + $0x160] ss:$16 sps:$4 sm:$0xff]  }
  0x23   :  { %v3884_v47 = vld [vmem:[#allocation2 + $0x168] ss:$16 sps:$4 sm:$0xff]   ;;  %v3911_v48 = vld [vmem:[%s4726_s0 + $0x4] ss:$28 sps:$4 sm:$0xff]   ;;  %v3887_v50 = vld [vmem:[#allocation2 + $0x18c] ss:$16 sps:$4 sm:$0xff]  }
  0x24   :  { %v3885_v49 = vld [vmem:[#allocation2 + $0x184] ss:$16 sps:$4 sm:$0xff]   ;;  %1659 = vmatprep.mubr.bf16.mxu0 %v3911_v48  ;;  %2111 = vmatprep.mubr.bf16.mxu1 %v3911_v48  ;;  %v3889_v51 = vld [vmem:[#allocation2 + $0x180] ss:$16 sps:$4 sm:$0xff]   ;;  %v3890_v52 = vld [vmem:[#allocation2 + $0x188] ss:$16 sps:$4 sm:$0xff]  }
  0x25   :  { %1636 = vmatpush1.bf16.msra.mxu0 %v3841_v18  ;;  %2088 = vmatpush1.bf16.msra.mxu1 %v3842_v19  ;;  %v3891_v53 = vld [vmem:[#allocation2 + $0x1a4] ss:$16 sps:$4 sm:$0xff]   ;;  %v3893_v54 = vld [vmem:[#allocation2 + $0x1ac] ss:$16 sps:$4 sm:$0xff]   ;;  %v3895_v55 = vld [vmem:[#allocation2 + $0x1a0] ss:$16 sps:$4 sm:$0xff]  }
  0x26   :  { %1637 = vmatprep.subr.bf16.mxu0 %v3843_v20  ;;  %2089 = vmatprep.subr.bf16.mxu1 %v3845_v21  ;;  %v3896_v56 = vld [vmem:[#allocation2 + $0x1a8] ss:$16 sps:$4 sm:$0xff]   ;;  %v3897_v57 = vld [vmem:[#allocation2 + $0x1c4] ss:$16 sps:$4 sm:$0xff]   ;;  %v3899_v58 = vld [vmem:[#allocation2 + $0x1cc] ss:$16 sps:$4 sm:$0xff]  }
  0x27   :  { %v3901_v59 = vld [vmem:[#allocation2 + $0x1c0] ss:$16 sps:$4 sm:$0xff]   ;;  %v3902_v60 = vld [vmem:[#allocation2 + $0x1c8] ss:$16 sps:$4 sm:$0xff]   ;;  %v3903_v61 = vld [vmem:[#allocation2 + $0x1e4] ss:$16 sps:$4 sm:$0xff]  }
  0x28   :  { %v3905_v62 = vld [vmem:[#allocation2 + $0x1ec] ss:$16 sps:$4 sm:$0xff]   ;;  %v3907_v63 = vld [vmem:[#allocation2 + $0x1e0] ss:$16 sps:$4 sm:$0xff]   ;;  %v3908_v0 = vld [vmem:[#allocation2 + $0x1e8] ss:$16 sps:$4 sm:$0xff]  }
  0x29   :  { %1638 = vmatpush1.bf16.msra.mxu0 %v3847_v22  ;;  %2090 = vmatpush1.bf16.msra.mxu1 %v3848_v23  ;;  %v3914_v1 = vld [vmem:[#allocation2 + $0x204] ss:$16 sps:$4 sm:$0xff]   ;;  %v3917_v2 = vld [vmem:[#allocation2 + $0x20c] ss:$16 sps:$4 sm:$0xff]   ;;  %v3912_v4 = vld [vmem:[#allocation2 + $0x200] ss:$16 sps:$4 sm:$0xff]  }
  0x2a   :  { %1639 = vmatprep.subr.bf16.mxu0 %v3849_v24  ;;  %2091 = vmatprep.subr.bf16.mxu1 %v3851_v25  ;;  %v3909_v3 = vld [vmem:[%s4726_s0] ss:$28 sps:$4 sm:$0xff]   ;;  %v3915_v5 = vld [vmem:[#allocation2 + $0x208] ss:$16 sps:$4 sm:$0xff]   ;;  %v3920_v6 = vld [vmem:[#allocation2 + $0x224] ss:$16 sps:$4 sm:$0xff]  }
  0x2b   :  { %v3923_v7 = vld [vmem:[#allocation2 + $0x22c] ss:$16 sps:$4 sm:$0xff]   ;;  %v3918_v9 = vld [vmem:[#allocation2 + $0x220] ss:$16 sps:$4 sm:$0xff]   ;;  %v3921_v10 = vld [vmem:[#allocation2 + $0x228] ss:$16 sps:$4 sm:$0xff]  }
  0x2c   :  { %v3924_v8 = vld [vmem:[%s4726_s0 + $0x3c] ss:$28 sps:$4 sm:$0xff]   ;;  %v3929_v11 = vld [vmem:[#allocation2 + $0x244] ss:$16 sps:$4 sm:$0xff]   ;;  %v3927_v14 = vld [vmem:[#allocation2 + $0x240] ss:$16 sps:$4 sm:$0xff]  }
  0x2d   :  { %1640 = vmatpush1.bf16.msra.mxu0 %v3853_v26  ;;  %2092 = vmatpush1.bf16.msra.mxu1 %v3854_v27  ;;  %v3932_v12 = vld [vmem:[#allocation2 + $0x24c] ss:$16 sps:$4 sm:$0xff]   ;;  %v3926_v13 = vld [vmem:[%s4726_s0 + $0x38] ss:$28 sps:$4 sm:$0xff]   ;;  %v3933_v19 = vld [vmem:[#allocation2 + $0x260] ss:$16 sps:$4 sm:$0xff]  }
  0x2e   :  { %1641 = vmatprep.subr.bf16.mxu0 %v3855_v28  ;;  %2093 = vmatprep.subr.bf16.mxu1 %v3857_v29  ;;  %v3930_v15 = vld [vmem:[#allocation2 + $0x248] ss:$16 sps:$4 sm:$0xff]   ;;  %v3935_v16 = vld [vmem:[#allocation2 + $0x264] ss:$16 sps:$4 sm:$0xff]   ;;  %v3938_v17 = vld [vmem:[#allocation2 + $0x26c] ss:$16 sps:$4 sm:$0xff]  }
  0x2f   :  { %v3939_v18 = vld [vmem:[%s4726_s0 + $0x74] ss:$28 sps:$4 sm:$0xff]   ;;  %v3936_v20 = vld [vmem:[#allocation2 + $0x268] ss:$16 sps:$4 sm:$0xff]   ;;  %v3947_v22 = vld [vmem:[#allocation2 + $0x28c] ss:$16 sps:$4 sm:$0xff]  }
  0x30   :  { %v3944_v21 = vld [vmem:[#allocation2 + $0x284] ss:$16 sps:$4 sm:$0xff]   ;;  %v3941_v23 = vld [vmem:[%s4726_s0 + $0x70] ss:$28 sps:$4 sm:$0xff]   ;;  %v3945_v25 = vld [vmem:[#allocation2 + $0x288] ss:$16 sps:$4 sm:$0xff]  }
  0x31   :  { %1642 = vmatpush1.bf16.msra.mxu0 %v3859_v30  ;;  %2094 = vmatpush1.bf16.msra.mxu1 %v3860_v31  ;;  %v3942_v24 = vld [vmem:[#allocation2 + $0x280] ss:$16 sps:$4 sm:$0xff]   ;;  %v3950_v26 = vld [vmem:[#allocation2 + $0x2a4] ss:$16 sps:$4 sm:$0xff]   ;;  %v3953_v27 = vld [vmem:[#allocation2 + $0x2ac] ss:$16 sps:$4 sm:$0xff]  }
  0x32   :  { %1643 = vmatprep.subr.bf16.mxu0 %v3861_v32  ;;  %2095 = vmatprep.subr.bf16.mxu1 %v3863_v33  ;;  %v3954_v28 = vld [vmem:[%s4726_s0 + $0xac] ss:$28 sps:$4 sm:$0xff]   ;;  %v3948_v29 = vld [vmem:[#allocation2 + $0x2a0] ss:$16 sps:$4 sm:$0xff]   ;;  %v3959_v31 = vld [vmem:[#allocation2 + $0x2c4] ss:$16 sps:$4 sm:$0xff]  }
  0x33   :  { %v3951_v30 = vld [vmem:[#allocation2 + $0x2a8] ss:$16 sps:$4 sm:$0xff]   ;;  %v3962_v32 = vld [vmem:[#allocation2 + $0x2cc] ss:$16 sps:$4 sm:$0xff]   ;;  %vm1602_vm0 = vcmask 261120  }
  0x34   :  { %v3956_v33 = vld [vmem:[%s4726_s0 + $0xa8] ss:$28 sps:$4 sm:$0xff]   ;;  %v3984_v48 = vld [vmem:[%s4726_s0 + $0x11c] ss:$28 sps:$4 sm:$0xff]  }
  0x35   :  { %1644 = vmatpush1.bf16.msra.mxu0 %v3865_v34  ;;  %2096 = vmatpush1.bf16.msra.mxu1 %v3866_v35  ;;  %v3957_v34 = vld [vmem:[#allocation2 + $0x2c0] ss:$16 sps:$4 sm:$0xff]   ;;  %v3960_v35 = vld [vmem:[#allocation2 + $0x2c8] ss:$16 sps:$4 sm:$0xff]  }
  0x36   :  { %1645 = vmatprep.subr.bf16.mxu0 %v3867_v36  ;;  %2097 = vmatprep.subr.bf16.mxu1 %v3869_v37  ;;  %v3965_v36 = vld [vmem:[#allocation2 + $0x2e4] ss:$16 sps:$4 sm:$0xff]   ;;  %v3968_v37 = vld [vmem:[#allocation2 + $0x2ec] ss:$16 sps:$4 sm:$0xff]  }
  0x39   :  { %1646 = vmatpush1.bf16.msra.mxu0 %v3871_v38  ;;  %2098 = vmatpush1.bf16.msra.mxu1 %v3872_v39  ;;  %v3969_v38 = vld [vmem:[%s4726_s0 + $0xe4] ss:$28 sps:$4 sm:$0xff]  }
  0x3a   :  { %1647 = vmatprep.subr.bf16.mxu0 %v3873_v40  ;;  %2099 = vmatprep.subr.bf16.mxu1 %v3875_v41  ;;  %v3963_v39 = vld [vmem:[#allocation2 + $0x2e0] ss:$16 sps:$4 sm:$0xff]   ;;  %v3966_v40 = vld [vmem:[#allocation2 + $0x2e8] ss:$16 sps:$4 sm:$0xff]   ;;  %v3974_v41 = vld [vmem:[#allocation2 + $0x304] ss:$16 sps:$4 sm:$0xff]  }
  0x3d   :  { %1648 = vmatpush1.bf16.msra.mxu0 %v3877_v42  ;;  %2100 = vmatpush1.bf16.msra.mxu1 %v3878_v43  ;;  %v3977_v42 = vld [vmem:[#allocation2 + $0x30c] ss:$16 sps:$4 sm:$0xff]  }
  0x3e   :  { %1649 = vmatprep.subr.bf16.mxu0 %v3879_v44  ;;  %2101 = vmatprep.subr.bf16.mxu1 %v3881_v45  ;;  %v3971_v43 = vld [vmem:[%s4726_s0 + $0xe0] ss:$28 sps:$4 sm:$0xff]   ;;  %v3975_v45 = vld [vmem:[#allocation2 + $0x308] ss:$16 sps:$4 sm:$0xff]  }
  0x3f   :  { %v3972_v44 = vld [vmem:[#allocation2 + $0x300] ss:$16 sps:$4 sm:$0xff]  }
  0x41   :  { %1650 = vmatpush1.bf16.msra.mxu0 %v3883_v46  ;;  %2102 = vmatpush1.bf16.msra.mxu1 %v3884_v47  ;;  %v3980_v46 = vld [vmem:[#allocation2 + $0x324] ss:$16 sps:$4 sm:$0xff]   ;;  %v3983_v47 = vld [vmem:[#allocation2 + $0x32c] ss:$16 sps:$4 sm:$0xff]  }
  0x42   :  { %1651 = vmatprep.subr.bf16.mxu0 %v3885_v49  ;;  %2103 = vmatprep.subr.bf16.mxu1 %v3887_v50  ;;  %v3978_v49 = vld [vmem:[#allocation2 + $0x320] ss:$16 sps:$4 sm:$0xff]   ;;  %v3981_v50 = vld [vmem:[#allocation2 + $0x328] ss:$16 sps:$4 sm:$0xff]  }
  0x45   :  { %1652 = vmatpush1.bf16.msra.mxu0 %v3889_v51  ;;  %2104 = vmatpush1.bf16.msra.mxu1 %v3890_v52  ;;  %v3989_v51 = vld [vmem:[#allocation2 + $0x344] ss:$16 sps:$4 sm:$0xff]   ;;  %v3992_v52 = vld [vmem:[#allocation2 + $0x34c] ss:$16 sps:$4 sm:$0xff]  }
  0x46   :  { %1653 = vmatprep.subr.bf16.mxu0 %v3891_v53  ;;  %2105 = vmatprep.subr.bf16.mxu1 %v3893_v54  ;;  %v3986_v53 = vld [vmem:[%s4726_s0 + $0x118] ss:$28 sps:$4 sm:$0xff]   ;;  %v3987_v54 = vld [vmem:[#allocation2 + $0x340] ss:$16 sps:$4 sm:$0xff]  }
  0x49   :  { %1654 = vmatpush1.bf16.msra.mxu0 %v3895_v55  ;;  %2106 = vmatpush1.bf16.msra.mxu1 %v3896_v56  ;;  %v3990_v55 = vld [vmem:[#allocation2 + $0x348] ss:$16 sps:$4 sm:$0xff]   ;;  %v3995_v56 = vld [vmem:[#allocation2 + $0x364] ss:$16 sps:$4 sm:$0xff]  }
  0x4a   :  { %1655 = vmatprep.subr.bf16.mxu0 %v3897_v57  ;;  %2107 = vmatprep.subr.bf16.mxu1 %v3899_v58  ;;  %v3998_v57 = vld [vmem:[#allocation2 + $0x36c] ss:$16 sps:$4 sm:$0xff]   ;;  %v3999_v58 = vld [vmem:[%s4726_s0 + $0x154] ss:$28 sps:$4 sm:$0xff]  }
  0x4d   :  { %1656 = vmatpush1.bf16.msra.mxu0 %v3901_v59  ;;  %2108 = vmatpush1.bf16.msra.mxu1 %v3902_v60  ;;  %v3993_v59 = vld [vmem:[#allocation2 + $0x360] ss:$16 sps:$4 sm:$0xff]   ;;  %v3996_v60 = vld [vmem:[#allocation2 + $0x368] ss:$16 sps:$4 sm:$0xff]  }
  0x4e   :  { %1657 = vmatprep.subr.bf16.mxu0 %v3903_v61  ;;  %2109 = vmatprep.subr.bf16.mxu1 %v3905_v62  ;;  %v4004_v61 = vld [vmem:[#allocation2 + $0x384] ss:$16 sps:$4 sm:$0xff]   ;;  %v4007_v62 = vld [vmem:[#allocation2 + $0x38c] ss:$16 sps:$4 sm:$0xff]  }
  0x51   :  { %1658 = vmatpush1.bf16.msra.mxu0 %v3907_v63  ;;  %2110 = vmatpush1.bf16.msra.mxu1 %v3908_v0  ;;  %v4001_v63 = vld [vmem:[%s4726_s0 + $0x150] ss:$28 sps:$4 sm:$0xff]  }
  0x52   :  { %1740 = vmatprep.subr.bf16.mxu0 %v3914_v1  ;;  %2192 = vmatprep.subr.bf16.mxu1 %v3917_v2  ;;  %v4002_v0 = vld [vmem:[#allocation2 + $0x380] ss:$16 sps:$4 sm:$0xff]   ;;  %v4005_v1 = vld [vmem:[#allocation2 + $0x388] ss:$16 sps:$4 sm:$0xff]   ;;  %v4010_v2 = vld [vmem:[#allocation2 + $0x3a4] ss:$16 sps:$4 sm:$0xff]  }
  0x54   :  { %1660 = vmatmul.mubr.bf16.vlgmr.msra.gmra.mrb[0].mxu0 %v3909_v3  ;;  %2112 = vmatmul.mubr.bf16.vlgmr.msra.gmra.mrb[0].mxu1 %v3909_v3  ;;  %v4013_v3 = vld [vmem:[#allocation2 + $0x3ac] ss:$16 sps:$4 sm:$0xff]  }
  0x55   :  { %1741 = vmatpush1.bf16.msra.mxu0 %v3912_v4  ;;  %2193 = vmatpush1.bf16.msra.mxu1 %v3915_v5  ;;  %v4014_v4 = vld [vmem:[%s4726_s0 + $0x18c] ss:$28 sps:$4 sm:$0xff]   ;;  %v4008_v5 = vld [vmem:[#allocation2 + $0x3a0] ss:$16 sps:$4 sm:$0xff]  }
  0x56   :  { %1742 = vmatprep.subr.bf16.mxu0 %v3920_v6  ;;  %2194 = vmatprep.subr.bf16.mxu1 %v3923_v7  ;;  %v4011_v6 = vld [vmem:[#allocation2 + $0x3a8] ss:$16 sps:$4 sm:$0xff]   ;;  %v4019_v7 = vld [vmem:[#allocation2 + $0x3c4] ss:$16 sps:$4 sm:$0xff]  }
  0x57   :  { %1669 = vmatprep.mubr.bf16.mxu0 %v3924_v8  ;;  %2121 = vmatprep.mubr.bf16.mxu1 %v3924_v8  ;;  %v4022_v8 = vld [vmem:[#allocation2 + $0x3cc] ss:$16 sps:$4 sm:$0xff]  }
  0x59   :  { %1743 = vmatpush1.bf16.msra.mxu0 %v3918_v9  ;;  %2195 = vmatpush1.bf16.msra.mxu1 %v3921_v10  ;;  %v4016_v9 = vld [vmem:[%s4726_s0 + $0x188] ss:$28 sps:$4 sm:$0xff]   ;;  %v4017_v10 = vld [vmem:[#allocation2 + $0x3c0] ss:$16 sps:$4 sm:$0xff]  }
  0x5a   :  { %1744 = vmatprep.subr.bf16.mxu0 %v3929_v11  ;;  %2196 = vmatprep.subr.bf16.mxu1 %v3932_v12  ;;  %v4020_v11 = vld [vmem:[#allocation2 + $0x3c8] ss:$16 sps:$4 sm:$0xff]   ;;  %v4025_v12 = vld [vmem:[#allocation2 + $0x3e4] ss:$16 sps:$4 sm:$0xff]  }
  0x5c   :  { %1670 = vmatmul.mubr.bf16.gmra.mrb[4].mxu0 %v3926_v13  ;;  %2122 = vmatmul.mubr.bf16.gmra.mrb[4].mxu1 %v3926_v13  ;;  %v4028_v13 = vld [vmem:[#allocation2 + $0x3ec] ss:$16 sps:$4 sm:$0xff]  }
  0x5d   :  { %1745 = vmatpush1.bf16.msra.mxu0 %v3927_v14  ;;  %2197 = vmatpush1.bf16.msra.mxu1 %v3930_v15  ;;  %v4031_v14 = vld [vmem:[%s4726_s0 + $0xc] ss:$28 sps:$4 sm:$0xff]   ;;  %v4023_v15 = vld [vmem:[#allocation2 + $0x3e0] ss:$16 sps:$4 sm:$0xff]  }
  0x5e   :  { %1746 = vmatprep.subr.bf16.mxu0 %v3935_v16  ;;  %2198 = vmatprep.subr.bf16.mxu1 %v3938_v17  ;;  %v4026_v16 = vld [vmem:[#allocation2 + $0x3e8] ss:$16 sps:$4 sm:$0xff]   ;;  %v4034_v17 = vld [vmem:[#allocation2 + $0x404] ss:$16 sps:$4 sm:$0xff]  }
  0x5f   :  { %1679 = vmatprep.mubr.bf16.mxu0 %v3939_v18  ;;  %2131 = vmatprep.mubr.bf16.mxu1 %v3939_v18  ;;  %v4037_v18 = vld [vmem:[#allocation2 + $0x40c] ss:$16 sps:$4 sm:$0xff]  }
  0x61   :  { %1747 = vmatpush1.bf16.msra.mxu0 %v3933_v19  ;;  %2199 = vmatpush1.bf16.msra.mxu1 %v3936_v20  ;;  %v4029_v19 = vld [vmem:[%s4726_s0 + $0x8] ss:$28 sps:$4 sm:$0xff]   ;;  %v4032_v20 = vld [vmem:[#allocation2 + $0x400] ss:$16 sps:$4 sm:$0xff]  }
  0x62   :  { %1748 = vmatprep.subr.bf16.mxu0 %v3944_v21  ;;  %2200 = vmatprep.subr.bf16.mxu1 %v3947_v22  ;;  %v4035_v21 = vld [vmem:[#allocation2 + $0x408] ss:$16 sps:$4 sm:$0xff]   ;;  %v4040_v22 = vld [vmem:[#allocation2 + $0x424] ss:$16 sps:$4 sm:$0xff]  }
  0x64   :  { %1680 = vmatmul.mubr.bf16.gmra.mrb[8].mxu0 %v3941_v23  ;;  %2132 = vmatmul.mubr.bf16.gmra.mrb[8].mxu1 %v3941_v23  ;;  %v4043_v23 = vld [vmem:[#allocation2 + $0x42c] ss:$16 sps:$4 sm:$0xff]  }
  0x65   :  { %1749 = vmatpush1.bf16.msra.mxu0 %v3942_v24  ;;  %2201 = vmatpush1.bf16.msra.mxu1 %v3945_v25  ;;  %v4044_v24 = vld [vmem:[%s4726_s0 + $0x44] ss:$28 sps:$4 sm:$0xff]  }
  0x66   :  { %1750 = vmatprep.subr.bf16.mxu0 %v3950_v26  ;;  %2202 = vmatprep.subr.bf16.mxu1 %v3953_v27  ;;  %v4038_v25 = vld [vmem:[#allocation2 + $0x420] ss:$16 sps:$4 sm:$0xff]   ;;  %v4041_v26 = vld [vmem:[#allocation2 + $0x428] ss:$16 sps:$4 sm:$0xff]   ;;  %v4049_v27 = vld [vmem:[#allocation2 + $0x444] ss:$16 sps:$4 sm:$0xff]  }
  0x67   :  { %1689 = vmatprep.mubr.bf16.mxu0 %v3954_v28  ;;  %2141 = vmatprep.mubr.bf16.mxu1 %v3954_v28  ;;  %v4052_v28 = vld [vmem:[#allocation2 + $0x44c] ss:$16 sps:$4 sm:$0xff]  }
  0x69   :  { %1751 = vmatpush1.bf16.msra.mxu0 %v3948_v29  ;;  %2203 = vmatpush1.bf16.msra.mxu1 %v3951_v30  ;;  %v4046_v29 = vld [vmem:[%s4726_s0 + $0x40] ss:$28 sps:$4 sm:$0xff]  }
  0x6a   :  { %1752 = vmatprep.subr.bf16.mxu0 %v3959_v31  ;;  %2204 = vmatprep.subr.bf16.mxu1 %v3962_v32  ;;  %v4047_v30 = vld [vmem:[#allocation2 + $0x440] ss:$16 sps:$4 sm:$0xff]   ;;  %v4050_v31 = vld [vmem:[#allocation2 + $0x448] ss:$16 sps:$4 sm:$0xff]   ;;  %v4055_v32 = vld [vmem:[#allocation2 + $0x464] ss:$16 sps:$4 sm:$0xff]  }
  0x6c   :  { %1690 = vmatmul.mubr.bf16.gmra.mrb[12].mxu0 %v3956_v33  ;;  %2142 = vmatmul.mubr.bf16.gmra.mrb[12].mxu1 %v3956_v33  ;;  %v4058_v33 = vld [vmem:[#allocation2 + $0x46c] ss:$16 sps:$4 sm:$0xff]  }
  0x6d   :  { %1753 = vmatpush1.bf16.msra.mxu0 %v3957_v34  ;;  %2205 = vmatpush1.bf16.msra.mxu1 %v3960_v35  ;;  %v4059_v34 = vld [vmem:[%s4726_s0 + $0x7c] ss:$28 sps:$4 sm:$0xff]   ;;  %v4053_v35 = vld [vmem:[#allocation2 + $0x460] ss:$16 sps:$4 sm:$0xff]  }
  0x6e   :  { %1754 = vmatprep.subr.bf16.mxu0 %v3965_v36  ;;  %2206 = vmatprep.subr.bf16.mxu1 %v3968_v37  ;;  %v4056_v36 = vld [vmem:[#allocation2 + $0x468] ss:$16 sps:$4 sm:$0xff]   ;;  %v4064_v37 = vld [vmem:[#allocation2 + $0x484] ss:$16 sps:$4 sm:$0xff]  }
  0x6f   :  { %1699 = vmatprep.mubr.bf16.mxu0 %v3969_v38  ;;  %2151 = vmatprep.mubr.bf16.mxu1 %v3969_v38  ;;  %v4067_v38 = vld [vmem:[#allocation2 + $0x48c] ss:$16 sps:$4 sm:$0xff]  }
  0x71   :  { %1755 = vmatpush1.bf16.msra.mxu0 %v3963_v39  ;;  %2207 = vmatpush1.bf16.msra.mxu1 %v3966_v40  ;;  %v4061_v39 = vld [vmem:[%s4726_s0 + $0x78] ss:$28 sps:$4 sm:$0xff]   ;;  %v4062_v40 = vld [vmem:[#allocation2 + $0x480] ss:$16 sps:$4 sm:$0xff]  }
  0x72   :  { %1756 = vmatprep.subr.bf16.mxu0 %v3974_v41  ;;  %2208 = vmatprep.subr.bf16.mxu1 %v3977_v42  ;;  %v4065_v41 = vld [vmem:[#allocation2 + $0x488] ss:$16 sps:$4 sm:$0xff]   ;;  %v4070_v42 = vld [vmem:[#allocation2 + $0x4a4] ss:$16 sps:$4 sm:$0xff]  }
  0x74   :  { %1700 = vmatmul.mubr.bf16.gmra.mrb[16].mxu0 %v3971_v43  ;;  %2152 = vmatmul.mubr.bf16.gmra.mrb[16].mxu1 %v3971_v43  ;;  %v4073_v43 = vld [vmem:[#allocation2 + $0x4ac] ss:$16 sps:$4 sm:$0xff]  }
  0x75   :  { %1757 = vmatpush1.bf16.msra.mxu0 %v3972_v44  ;;  %2209 = vmatpush1.bf16.msra.mxu1 %v3975_v45  ;;  %v4074_v44 = vld [vmem:[%s4726_s0 + $0xb4] ss:$28 sps:$4 sm:$0xff]  }
  0x76   :  { %1758 = vmatprep.subr.bf16.mxu0 %v3980_v46  ;;  %2210 = vmatprep.subr.bf16.mxu1 %v3983_v47  ;;  %v4068_v45 = vld [vmem:[#allocation2 + $0x4a0] ss:$16 sps:$4 sm:$0xff]   ;;  %v4071_v46 = vld [vmem:[#allocation2 + $0x4a8] ss:$16 sps:$4 sm:$0xff]   ;;  %v4079_v47 = vld [vmem:[#allocation2 + $0x4c4] ss:$16 sps:$4 sm:$0xff]  }
  0x77   :  { %1709 = vmatprep.mubr.bf16.mxu0 %v3984_v48  ;;  %2161 = vmatprep.mubr.bf16.mxu1 %v3984_v48  ;;  %v4082_v48 = vld [vmem:[#allocation2 + $0x4cc] ss:$16 sps:$4 sm:$0xff]  }
  0x79   :  { %1759 = vmatpush1.bf16.msra.mxu0 %v3978_v49  ;;  %2211 = vmatpush1.bf16.msra.mxu1 %v3981_v50  ;;  %v4076_v49 = vld [vmem:[%s4726_s0 + $0xb0] ss:$28 sps:$4 sm:$0xff]  }
  0x7a   :  { %1760 = vmatprep.subr.bf16.mxu0 %v3989_v51  ;;  %2212 = vmatprep.subr.bf16.mxu1 %v3992_v52  ;;  %v4077_v50 = vld [vmem:[#allocation2 + $0x4c0] ss:$16 sps:$4 sm:$0xff]   ;;  %v4080_v51 = vld [vmem:[#allocation2 + $0x4c8] ss:$16 sps:$4 sm:$0xff]   ;;  %v4085_v52 = vld [vmem:[#allocation2 + $0x4e4] ss:$16 sps:$4 sm:$0xff]  }
  0x7c   :  { %1710 = vmatmul.mubr.bf16.gmra.mrb[20].mxu0 %v3986_v53  ;;  %2162 = vmatmul.mubr.bf16.gmra.mrb[20].mxu1 %v3986_v53  ;;  %v4088_v53 = vld [vmem:[#allocation2 + $0x4ec] ss:$16 sps:$4 sm:$0xff]  }
  0x7d   :  { %1761 = vmatpush1.bf16.msra.mxu0 %v3987_v54  ;;  %2213 = vmatpush1.bf16.msra.mxu1 %v3990_v55  ;;  %v4089_v54 = vld [vmem:[%s4726_s0 + $0xec] ss:$28 sps:$4 sm:$0xff]   ;;  %v4083_v55 = vld [vmem:[#allocation2 + $0x4e0] ss:$16 sps:$4 sm:$0xff]  }
  0x7e   :  { %1762 = vmatprep.subr.bf16.mxu0 %v3995_v56  ;;  %2214 = vmatprep.subr.bf16.mxu1 %v3998_v57  ;;  %v4086_v56 = vld [vmem:[#allocation2 + $0x4e8] ss:$16 sps:$4 sm:$0xff]   ;;  %v4094_v57 = vld [vmem:[#allocation2 + $0x504] ss:$16 sps:$4 sm:$0xff]  }
  0x7f   :  { %1719 = vmatprep.mubr.bf16.mxu0 %v3999_v58  ;;  %2171 = vmatprep.mubr.bf16.mxu1 %v3999_v58  ;;  %v4097_v58 = vld [vmem:[#allocation2 + $0x50c] ss:$16 sps:$4 sm:$0xff]  }
  0x81   :  { %1763 = vmatpush1.bf16.msra.mxu0 %v3993_v59  ;;  %2215 = vmatpush1.bf16.msra.mxu1 %v3996_v60  ;;  %v4091_v59 = vld [vmem:[%s4726_s0 + $0xe8] ss:$28 sps:$4 sm:$0xff]   ;;  %v4092_v60 = vld [vmem:[#allocation2 + $0x500] ss:$16 sps:$4 sm:$0xff]  }
  0x82   :  { %1764 = vmatprep.subr.bf16.mxu0 %v4004_v61  ;;  %2216 = vmatprep.subr.bf16.mxu1 %v4007_v62  ;;  %v4095_v61 = vld [vmem:[#allocation2 + $0x508] ss:$16 sps:$4 sm:$0xff]   ;;  %v4100_v62 = vld [vmem:[#allocation2 + $0x524] ss:$16 sps:$4 sm:$0xff]  }
  0x84   :  { %1720 = vmatmul.mubr.bf16.gmra.mrb[24].mxu0 %v4001_v63  ;;  %2172 = vmatmul.mubr.bf16.gmra.mrb[24].mxu1 %v4001_v63  ;;  %v4103_v63 = vld [vmem:[#allocation2 + $0x52c] ss:$16 sps:$4 sm:$0xff]  }
  0x85   :  { %1765 = vmatpush1.bf16.msra.mxu0 %v4002_v0  ;;  %2217 = vmatpush1.bf16.msra.mxu1 %v4005_v1  ;;  %v4104_v0 = vld [vmem:[%s4726_s0 + $0x124] ss:$28 sps:$4 sm:$0xff]  }
  0x86   :  { %1766 = vmatprep.subr.bf16.mxu0 %v4010_v2  ;;  %2218 = vmatprep.subr.bf16.mxu1 %v4013_v3  ;;  %v4098_v1 = vld [vmem:[#allocation2 + $0x520] ss:$16 sps:$4 sm:$0xff]   ;;  %v4101_v2 = vld [vmem:[#allocation2 + $0x528] ss:$16 sps:$4 sm:$0xff]   ;;  %v4109_v3 = vld [vmem:[#allocation2 + $0x544] ss:$16 sps:$4 sm:$0xff]  }
  0x87   :  { %1729 = vmatprep.mubr.bf16.mxu0 %v4014_v4  ;;  %2181 = vmatprep.mubr.bf16.mxu1 %v4014_v4  ;;  %v4106_v4 = vld [vmem:[%s4726_s0 + $0x120] ss:$28 sps:$4 sm:$0xff]  }
  0x89   :  { %1767 = vmatpush1.bf16.msra.mxu0 %v4008_v5  ;;  %2219 = vmatpush1.bf16.msra.mxu1 %v4011_v6  ;;  %v4112_v5 = vld [vmem:[#allocation2 + $0x54c] ss:$16 sps:$4 sm:$0xff]   ;;  %v4107_v6 = vld [vmem:[#allocation2 + $0x540] ss:$16 sps:$4 sm:$0xff]  }
  0x8a   :  { %1768 = vmatprep.subr.bf16.mxu0 %v4019_v7  ;;  %2220 = vmatprep.subr.bf16.mxu1 %v4022_v8  ;;  %v4110_v7 = vld [vmem:[#allocation2 + $0x548] ss:$16 sps:$4 sm:$0xff]   ;;  %v4115_v8 = vld [vmem:[#allocation2 + $0x564] ss:$16 sps:$4 sm:$0xff]  }
  0x8c   :  { %1730 = vmatmul.mubr.bf16.gmra.mrb[28].mxu0 %v4016_v9  ;;  %2182 = vmatmul.mubr.bf16.gmra.mrb[28].mxu1 %v4016_v9  ;;  %v4118_v9 = vld [vmem:[#allocation2 + $0x56c] ss:$16 sps:$4 sm:$0xff]  }
  0x8d   :  { %1769 = vmatpush1.bf16.msra.mxu0 %v4017_v10  ;;  %2221 = vmatpush1.bf16.msra.mxu1 %v4020_v11  ;;  %v4113_v10 = vld [vmem:[#allocation2 + $0x560] ss:$16 sps:$4 sm:$0xff]   ;;  %v4116_v11 = vld [vmem:[#allocation2 + $0x568] ss:$16 sps:$4 sm:$0xff]  }
  0x8e   :  { %1770 = vmatprep.subr.bf16.mxu0 %v4025_v12  ;;  %2222 = vmatprep.subr.bf16.mxu1 %v4028_v13  ;;  %v4119_v12 = vld [vmem:[%s4726_s0 + $0x15c] ss:$28 sps:$4 sm:$0xff]   ;;  %v4124_v13 = vld [vmem:[#allocation2 + $0x584] ss:$16 sps:$4 sm:$0xff]  }
  0x8f   :  { %1772 = vmatprep.mubr.bf16.mxu0 %v4031_v14  ;;  %2224 = vmatprep.mubr.bf16.mxu1 %v4031_v14  ;;  %v4127_v14 = vld [vmem:[#allocation2 + $0x58c] ss:$16 sps:$4 sm:$0xff]  }
  0x91   :  { %1771 = vmatpush1.bf16.msra.mxu0 %v4023_v15  ;;  %2223 = vmatpush1.bf16.msra.mxu1 %v4026_v16  ;;  %v4121_v15 = vld [vmem:[%s4726_s0 + $0x158] ss:$28 sps:$4 sm:$0xff]   ;;  %v4122_v16 = vld [vmem:[#allocation2 + $0x580] ss:$16 sps:$4 sm:$0xff]  }
  0x92   :  { %1853 = vmatprep.subr.bf16.mxu0 %v4034_v17  ;;  %2305 = vmatprep.subr.bf16.mxu1 %v4037_v18  ;;  %v4125_v17 = vld [vmem:[#allocation2 + $0x588] ss:$16 sps:$4 sm:$0xff]   ;;  %v4130_v18 = vld [vmem:[#allocation2 + $0x5a4] ss:$16 sps:$4 sm:$0xff]  }
  0x94   :  { %1773 = vmatmul.mubr.bf16.vlgmr.msra.gmra.mrb[0].mxu0 %v4029_v19  ;;  %2225 = vmatmul.mubr.bf16.vlgmr.msra.gmra.mrb[0].mxu1 %v4029_v19  ;;  %v4133_v19 = vld [vmem:[#allocation2 + $0x5ac] ss:$16 sps:$4 sm:$0xff]  }
  0x95   :  { %1854 = vmatpush1.bf16.msra.mxu0 %v4032_v20  ;;  %2306 = vmatpush1.bf16.msra.mxu1 %v4035_v21  ;;  %v4134_v20 = vld [vmem:[%s4726_s0 + $0x194] ss:$28 sps:$4 sm:$0xff]  }
  0x96   :  { %1855 = vmatprep.subr.bf16.mxu0 %v4040_v22  ;;  %2307 = vmatprep.subr.bf16.mxu1 %v4043_v23  ;;  %v4128_v21 = vld [vmem:[#allocation2 + $0x5a0] ss:$16 sps:$4 sm:$0xff]   ;;  %v4131_v22 = vld [vmem:[#allocation2 + $0x5a8] ss:$16 sps:$4 sm:$0xff]   ;;  %v4139_v23 = vld [vmem:[#allocation2 + $0x5c4] ss:$16 sps:$4 sm:$0xff]  }
  0x97   :  { %1782 = vmatprep.mubr.bf16.mxu0 %v4044_v24  ;;  %2234 = vmatprep.mubr.bf16.mxu1 %v4044_v24  ;;  %v4142_v24 = vld [vmem:[#allocation2 + $0x5cc] ss:$16 sps:$4 sm:$0xff]  }
  0x99   :  { %1856 = vmatpush1.bf16.msra.mxu0 %v4038_v25  ;;  %2308 = vmatpush1.bf16.msra.mxu1 %v4041_v26  ;;  %v4136_v25 = vld [vmem:[%s4726_s0 + $0x190] ss:$28 sps:$4 sm:$0xff]  }
  0x9a   :  { %1857 = vmatprep.subr.bf16.mxu0 %v4049_v27  ;;  %2309 = vmatprep.subr.bf16.mxu1 %v4052_v28  ;;  %v4137_v26 = vld [vmem:[#allocation2 + $0x5c0] ss:$16 sps:$4 sm:$0xff]   ;;  %v4140_v27 = vld [vmem:[#allocation2 + $0x5c8] ss:$16 sps:$4 sm:$0xff]   ;;  %v4145_v28 = vld [vmem:[#allocation2 + $0x5e4] ss:$16 sps:$4 sm:$0xff]  }
  0x9c   :  { %1783 = vmatmul.mubr.bf16.gmra.mrb[4].mxu0 %v4046_v29  ;;  %2235 = vmatmul.mubr.bf16.gmra.mrb[4].mxu1 %v4046_v29  ;;  %v4148_v29 = vld [vmem:[#allocation2 + $0x5ec] ss:$16 sps:$4 sm:$0xff]  }
  0x9d   :  { %1858 = vmatpush1.bf16.msra.mxu0 %v4047_v30  ;;  %2310 = vmatpush1.bf16.msra.mxu1 %v4050_v31  ;;  %v4151_v30 = vld [vmem:[%s4726_s0 + $0x14] ss:$28 sps:$4 sm:$0xff]  }
  0x9e   :  { %1859 = vmatprep.subr.bf16.mxu0 %v4055_v32  ;;  %2311 = vmatprep.subr.bf16.mxu1 %v4058_v33  ;;  %v4143_v31 = vld [vmem:[#allocation2 + $0x5e0] ss:$16 sps:$4 sm:$0xff]   ;;  %v4146_v32 = vld [vmem:[#allocation2 + $0x5e8] ss:$16 sps:$4 sm:$0xff]   ;;  %v4154_v33 = vld [vmem:[#allocation2 + $0x604] ss:$16 sps:$4 sm:$0xff]  }
  0x9f   :  { %1792 = vmatprep.mubr.bf16.mxu0 %v4059_v34  ;;  %2244 = vmatprep.mubr.bf16.mxu1 %v4059_v34  ;;  %v4157_v34 = vld [vmem:[#allocation2 + $0x60c] ss:$16 sps:$4 sm:$0xff]  }
  0xa1   :  { %1860 = vmatpush1.bf16.msra.mxu0 %v4053_v35  ;;  %2312 = vmatpush1.bf16.msra.mxu1 %v4056_v36  ;;  %v4149_v35 = vld [vmem:[%s4726_s0 + $0x10] ss:$28 sps:$4 sm:$0xff]  }
  0xa2   :  { %1861 = vmatprep.subr.bf16.mxu0 %v4064_v37  ;;  %2313 = vmatprep.subr.bf16.mxu1 %v4067_v38  ;;  %v4152_v36 = vld [vmem:[#allocation2 + $0x600] ss:$16 sps:$4 sm:$0xff]   ;;  %v4155_v37 = vld [vmem:[#allocation2 + $0x608] ss:$16 sps:$4 sm:$0xff]  }
  0xa3   :  { %v4158_v38 = vld [vmem:[%s4726_s0 + $0x4c] ss:$28 sps:$4 sm:$0xff]  }
  0xa4   :  { %1793 = vmatmul.mubr.bf16.gmra.mrb[8].mxu0 %v4061_v39  ;;  %2245 = vmatmul.mubr.bf16.gmra.mrb[8].mxu1 %v4061_v39  ;;  %v4172_v39 = vld [vmem:[#allocation2 + $0x624] ss:$16 sps:$4 sm:$0xff]  }
  0xa5   :  { %1862 = vmatpush1.bf16.msra.mxu0 %v4062_v40  ;;  %2314 = vmatpush1.bf16.msra.mxu1 %v4065_v41  ;;  %v4170_v40 = vld [vmem:[#allocation2 + $0x620] ss:$16 sps:$4 sm:$0xff]   ;;  %v4175_v41 = vld [vmem:[#allocation2 + $0x62c] ss:$16 sps:$4 sm:$0xff]  }
  0xa6   :  { %1863 = vmatprep.subr.bf16.mxu0 %v4070_v42  ;;  %2315 = vmatprep.subr.bf16.mxu1 %v4073_v43  ;;  %v4173_v42 = vld [vmem:[#allocation2 + $0x628] ss:$16 sps:$4 sm:$0xff]   ;;  %v4193_v43 = vld [vmem:[%s4729_s3 + $0x40] sm:$0xff]  }
  0xa7   :  { %1802 = vmatprep.mubr.bf16.mxu0 %v4074_v44  ;;  %2254 = vmatprep.mubr.bf16.mxu1 %v4074_v44  ;;  %v4195_v44 = vld [vmem:[%s4729_s3 + $0xc0] sm:$0xff]  }
  0xa9   :  { %1864 = vmatpush1.bf16.msra.mxu0 %v4068_v45  ;;  %2316 = vmatpush1.bf16.msra.mxu1 %v4071_v46  ;;  %v4160_v45 = vld [vmem:[%s4726_s0 + $0x48] ss:$28 sps:$4 sm:$0xff]  }
  0xaa   :  { %1865 = vmatprep.subr.bf16.mxu0 %v4079_v47  ;;  %2317 = vmatprep.subr.bf16.mxu1 %v4082_v48  ;;  %v4161_v46 = vld [vmem:[%s4726_s0 + $0x84] ss:$28 sps:$4 sm:$0xff]   ;;  %v4164_v48 = vld [vmem:[%s4726_s0 + $0xbc] ss:$28 sps:$4 sm:$0xff]  }
  0xab   :  { %v4163_v47 = vld [vmem:[%s4726_s0 + $0x80] ss:$28 sps:$4 sm:$0xff]  }
  0xac   :  { %1803 = vmatmul.mubr.bf16.gmra.mrb[12].mxu0 %v4076_v49  ;;  %2255 = vmatmul.mubr.bf16.gmra.mrb[12].mxu1 %v4076_v49  ;;  %v4166_v49 = vld [vmem:[%s4726_s0 + $0xb8] ss:$28 sps:$4 sm:$0xff]  }
  0xad   :  { %1866 = vmatpush1.bf16.msra.mxu0 %v4077_v50  ;;  %2318 = vmatpush1.bf16.msra.mxu1 %v4080_v51  ;;  %v4167_v50 = vld [vmem:[%s4726_s0 + $0xf4] ss:$28 sps:$4 sm:$0xff]  }
  0xae   :  { %1867 = vmatprep.subr.bf16.mxu0 %v4085_v52  ;;  %2319 = vmatprep.subr.bf16.mxu1 %v4088_v53  ;;  %v4169_v51 = vld [vmem:[%s4726_s0 + $0xf0] ss:$28 sps:$4 sm:$0xff]   ;;  %v4178_v53 = vld [vmem:[%s4726_s0 + $0x128] ss:$28 sps:$4 sm:$0xff]  }
  0xaf   :  { %1812 = vmatprep.mubr.bf16.mxu0 %v4089_v54  ;;  %2264 = vmatprep.mubr.bf16.mxu1 %v4089_v54  ;;  %v4176_v52 = vld [vmem:[%s4726_s0 + $0x12c] ss:$28 sps:$4 sm:$0xff]   ;;  %v4179_v54 = vld [vmem:[%s4726_s0 + $0x164] ss:$28 sps:$4 sm:$0xff]  }
  0xb1   :  { %1868 = vmatpush1.bf16.msra.mxu0 %v4083_v55  ;;  %2320 = vmatpush1.bf16.msra.mxu1 %v4086_v56  ;;  %v4181_v55 = vld [vmem:[%s4726_s0 + $0x160] ss:$28 sps:$4 sm:$0xff]  }
  0xb2   :  { %1869 = vmatprep.subr.bf16.mxu0 %v4094_v57  ;;  %2321 = vmatprep.subr.bf16.mxu1 %v4097_v58  ;;  %v4182_v56 = vld [vmem:[%s4726_s0 + $0x19c] ss:$28 sps:$4 sm:$0xff]   ;;  %v4276_v58 = vmov 0  }
  0xb3   :  { %v4184_v57 = vld [vmem:[%s4726_s0 + $0x198] ss:$28 sps:$4 sm:$0xff]  }
  0xb4   :  { %1813 = vmatmul.mubr.bf16.gmra.mrb[16].mxu0 %v4091_v59  ;;  %2265 = vmatmul.mubr.bf16.gmra.mrb[16].mxu1 %v4091_v59  ;;  %v4185_v59 = vld [vmem:[%s4726_s0 + $0x18] ss:$28 sps:$4 sm:$0xff]  }
  0xb5   :  { %1870 = vmatpush1.bf16.msra.mxu0 %v4092_v60  ;;  %2322 = vmatpush1.bf16.msra.mxu1 %v4095_v61  ;;  %v4194_v60 = vld [vmem:[%s4729_s3] sm:$0xff]  }
  0xb6   :  { %1871 = vmatprep.subr.bf16.mxu0 %v4100_v62  ;;  %2323 = vmatprep.subr.bf16.mxu1 %v4103_v63  ;;  %v4196_v61 = vld [vmem:[%s4729_s3 + $0x80] sm:$0xff]   ;;  %v4197_v62 = vld [vmem:[%s4729_s3 + $0x48] sm:$0xff]  }
  0xb7   :  { %1822 = vmatprep.mubr.bf16.mxu0 %v4104_v0  ;;  %2274 = vmatprep.mubr.bf16.mxu1 %v4104_v0  ;;  %v4199_v63 = vld [vmem:[%s4729_s3 + $0xc8] sm:$0xff]  }
  0xb8   :  { %v4198_v0 = vld [vmem:[%s4729_s3 + $0x8] sm:$0xff]  }
  0xb9   :  { %1872 = vmatpush1.bf16.msra.mxu0 %v4098_v1  ;;  %2324 = vmatpush1.bf16.msra.mxu1 %v4101_v2  ;;  %v4200_v1 = vld [vmem:[%s4729_s3 + $0x88] sm:$0xff]   ;;  %v4201_v2 = vld [vmem:[%s4729_s3 + $0x50] sm:$0xff]  }
  0xba   :  { %1873 = vmatprep.subr.bf16.mxu0 %v4109_v3  ;;  %2325 = vmatprep.subr.bf16.mxu1 %v4112_v5  ;;  %v4203_v3 = vld [vmem:[%s4729_s3 + $0xd0] sm:$0xff]  }
  0xbb   :  { %v4202_v5 = vld [vmem:[%s4729_s3 + $0x10] sm:$0xff]  }
  0xbc   :  { %1823 = vmatmul.mubr.bf16.gmra.mrb[20].mxu0 %v4106_v4  ;;  %2275 = vmatmul.mubr.bf16.gmra.mrb[20].mxu1 %v4106_v4  ;;  %v4186_v4 = vld [vmem:[%s4726_s0 + $0x50] ss:$28 sps:$4 sm:$0xff]  }
  0xbd   :  { %1874 = vmatpush1.bf16.msra.mxu0 %v4107_v6  ;;  %2326 = vmatpush1.bf16.msra.mxu1 %v4110_v7  ;;  %v4204_v6 = vld [vmem:[%s4729_s3 + $0x90] sm:$0xff]   ;;  %v4205_v7 = vld [vmem:[%s4729_s3 + $0x58] sm:$0xff]  }
  0xbe   :  { %1875 = vmatprep.subr.bf16.mxu0 %v4115_v8  ;;  %2327 = vmatprep.subr.bf16.mxu1 %v4118_v9  ;;  %v4207_v8 = vld [vmem:[%s4729_s3 + $0xd8] sm:$0xff]  }
  0xbf   :  { %1832 = vmatprep.mubr.bf16.mxu0 %v4119_v12  ;;  %2284 = vmatprep.mubr.bf16.mxu1 %v4119_v12  ;;  %v4206_v9 = vld [vmem:[%s4729_s3 + $0x18] sm:$0xff]   ;;  %v4211_v12 = vld [vmem:[%s4729_s3 + $0xe0] sm:$0xff]  }
  0xc1   :  { %1876 = vmatpush1.bf16.msra.mxu0 %v4113_v10  ;;  %2328 = vmatpush1.bf16.msra.mxu1 %v4116_v11  ;;  %v4208_v10 = vld [vmem:[%s4729_s3 + $0x98] sm:$0xff]   ;;  %v4209_v11 = vld [vmem:[%s4729_s3 + $0x60] sm:$0xff]  }
  0xc2   :  { %1877 = vmatprep.subr.bf16.mxu0 %v4124_v13  ;;  %2329 = vmatprep.subr.bf16.mxu1 %v4127_v14  ;;  %v4187_v13 = vld [vmem:[%s4726_s0 + $0x88] ss:$28 sps:$4 sm:$0xff]  }
  0xc3   :  { %v4210_v14 = vld [vmem:[%s4729_s3 + $0x20] sm:$0xff]  }
  0xc4   :  { %1833 = vmatmul.mubr.bf16.gmra.mrb[24].mxu0 %v4121_v15  ;;  %2285 = vmatmul.mubr.bf16.gmra.mrb[24].mxu1 %v4121_v15  ;;  %v4212_v15 = vld [vmem:[%s4729_s3 + $0xa0] sm:$0xff]  }
  0xc5   :  { %1878 = vmatpush1.bf16.msra.mxu0 %v4122_v16  ;;  %2330 = vmatpush1.bf16.msra.mxu1 %v4125_v17  ;;  %v4213_v16 = vld [vmem:[%s4729_s3 + $0x68] sm:$0xff]  }
  0xc6   :  { %1879 = vmatprep.subr.bf16.mxu0 %v4130_v18  ;;  %2331 = vmatprep.subr.bf16.mxu1 %v4133_v19  ;;  %v4215_v17 = vld [vmem:[%s4729_s3 + $0xe8] sm:$0xff]  }
  0xc7   :  { %1842 = vmatprep.mubr.bf16.mxu0 %v4134_v20  ;;  %2294 = vmatprep.mubr.bf16.mxu1 %v4134_v20  ;;  %v4214_v18 = vld [vmem:[%s4729_s3 + $0x28] sm:$0xff]   ;;  %v4217_v20 = vld [vmem:[%s4729_s3 + $0x70] sm:$0xff]  }
  0xc8   :  { %v4216_v19 = vld [vmem:[%s4729_s3 + $0xa8] sm:$0xff]  }
  0xc9   :  { %1880 = vmatpush1.bf16.msra.mxu0 %v4128_v21  ;;  %2332 = vmatpush1.bf16.msra.mxu1 %v4131_v22  ;;  %v4219_v21 = vld [vmem:[%s4729_s3 + $0xf0] sm:$0xff]   ;;  %v4188_v22 = vld [vmem:[%s4726_s0 + $0xc0] ss:$28 sps:$4 sm:$0xff]  }
  0xca   :  { %1881 = vmatprep.subr.bf16.mxu0 %v4139_v23  ;;  %2333 = vmatprep.subr.bf16.mxu1 %v4142_v24  ;;  %v4218_v23 = vld [vmem:[%s4729_s3 + $0x30] sm:$0xff]  }
  0xcb   :  { %v4220_v24 = vld [vmem:[%s4729_s3 + $0xb0] sm:$0xff]  }
  0xcc   :  { %1843 = vmatmul.mubr.bf16.gmra.mrb[28].mxu0 %v4136_v25  ;;  %2295 = vmatmul.mubr.bf16.gmra.mrb[28].mxu1 %v4136_v25  ;;  %v4189_v25 = vld [vmem:[%s4726_s0 + $0xf8] ss:$28 sps:$4 sm:$0xff]  }
  0xcd   :  { %1882 = vmatpush1.bf16.msra.mxu0 %v4137_v26  ;;  %2334 = vmatpush1.bf16.msra.mxu1 %v4140_v27  ;;  %v4190_v26 = vld [vmem:[%s4726_s0 + $0x130] ss:$28 sps:$4 sm:$0xff]   ;;  %v4191_v27 = vld [vmem:[%s4726_s0 + $0x168] ss:$28 sps:$4 sm:$0xff]  }
  0xce   :  { %1883 = vmatprep.subr.bf16.mxu0 %v4145_v28  ;;  %2335 = vmatprep.subr.bf16.mxu1 %v4148_v29  ;;  %v4192_v28 = vld [vmem:[%s4726_s0 + $0x1a0] ss:$28 sps:$4 sm:$0xff]  }
  0xcf   :  { %1885 = vmatprep.mubr.bf16.mxu0 %v4151_v30  ;;  %2337 = vmatprep.mubr.bf16.mxu1 %v4151_v30  ;;  %v4221_v29 = vld [vmem:[%s4729_s3 + $0x78] sm:$0xff]  }
  0xd0   :  { %v4223_v30 = vld [vmem:[%s4729_s3 + $0xf8] sm:$0xff]  }
  0xd1   :  { %1884 = vmatpush1.bf16.msra.mxu0 %v4143_v31  ;;  %2336 = vmatpush1.bf16.msra.mxu1 %v4146_v32  ;;  %v4222_v31 = vld [vmem:[%s4729_s3 + $0x38] sm:$0xff]  }
  0xd2   :  { %1966 = vmatprep.subr.bf16.mxu0 %v4154_v33  ;;  %2418 = vmatprep.subr.bf16.mxu1 %v4157_v34  ;;  %v4224_v32 = vld [vmem:[%s4729_s3 + $0xb8] sm:$0xff]   ;;  %v302_v33 = vlaneseq }
  0xd4   :  { %1886 = vmatmul.mubr.bf16.vlgmr.msra.gmra.mrb[0].mxu0 %v4149_v35  ;;  %2338 = vmatmul.mubr.bf16.vlgmr.msra.gmra.mrb[0].mxu1 %v4149_v35  ;;  %v303_v34 = vshrl.u32 %v302_v33, 7 }
  0xd5   :  { %1967 = vmatpush1.bf16.msra.mxu0 %v4152_v36  ;;  %2419 = vmatpush1.bf16.msra.mxu1 %v4155_v37  ;;  %v300_v37 = vld [vmem:[%s4728_s2] sm:$0xf] }
  0xd6   :  { %1895 = vmatprep.mubr.bf16.mxu0 %v4158_v38  ;;  %2347 = vmatprep.mubr.bf16.mxu1 %v4158_v38  ;;  %v304_v35 = vsub.s32 0, %v303_v34  ;;  %v312_v36 = vsub.s32 2, %v303_v34  ;;  %v308_v38 = vsub.s32 1, %v303_v34 }
  0xd7   :  { %1968 = vmatprep.subr.bf16.mxu0 %v4172_v39  ;;  %2420 = vmatprep.subr.bf16.mxu1 %v4175_v41  ;;  %v316_v39 = vsub.s32 3, %v303_v34 }
  0xd8   :  { %v4623_v41 = vrot.slane %v300_v37, %v312_v36 }
  0xd9   :  { %1969 = vmatpush1.bf16.msra.mxu0 %v4170_v40  ;;  %2421 = vmatpush1.bf16.msra.mxu1 %v4173_v42  ;;  %v4621_v40 = vrot.slane %v300_v37, %v304_v35  ;;  %v4625_v42 = vrot.slane %v300_v37, %v308_v38 }
  0xda   :  { %3422 = vmatprep.subr.bf16.mxu0 %v4193_v43  ;;  %3486 = vmatprep.subr.bf16.mxu1 %v4195_v44  ;;  %v4627_v43 = vrot.slane %v300_v37, %v316_v39 }
  0xdc   :  { %1896 = vmatmul.mubr.bf16.gmra.mrb[4].mxu0 %v4160_v45  ;;  %2348 = vmatmul.mubr.bf16.gmra.mrb[4].mxu1 %v4160_v45 }
  0xdd   :  { %1905 = vmatprep.mubr.bf16.mxu0 %v4161_v46  ;;  %2357 = vmatprep.mubr.bf16.mxu1 %v4161_v46 }
  0xe4   :  { %1906 = vmatmul.mubr.bf16.gmra.mrb[8].mxu0 %v4163_v47  ;;  %2358 = vmatmul.mubr.bf16.gmra.mrb[8].mxu1 %v4163_v47 }
  0xe5   :  { %1915 = vmatprep.mubr.bf16.mxu0 %v4164_v48  ;;  %2367 = vmatprep.mubr.bf16.mxu1 %v4164_v48 }
  0xec   :  { %1916 = vmatmul.mubr.bf16.gmra.mrb[12].mxu0 %v4166_v49  ;;  %2368 = vmatmul.mubr.bf16.gmra.mrb[12].mxu1 %v4166_v49 }
  0xed   :  { %1925 = vmatprep.mubr.bf16.mxu0 %v4167_v50  ;;  %2377 = vmatprep.mubr.bf16.mxu1 %v4167_v50 }
  0xf4   :  { %1926 = vmatmul.mubr.bf16.gmra.mrb[16].mxu0 %v4169_v51  ;;  %2378 = vmatmul.mubr.bf16.gmra.mrb[16].mxu1 %v4169_v51 }
  0xf5   :  { %1935 = vmatprep.mubr.bf16.mxu0 %v4176_v52  ;;  %2387 = vmatprep.mubr.bf16.mxu1 %v4176_v52 }
  0xfc   :  { %1936 = vmatmul.mubr.bf16.gmra.mrb[20].mxu0 %v4178_v53  ;;  %2388 = vmatmul.mubr.bf16.gmra.mrb[20].mxu1 %v4178_v53 }
  0xfd   :  { %1945 = vmatprep.mubr.bf16.mxu0 %v4179_v54  ;;  %2397 = vmatprep.mubr.bf16.mxu1 %v4179_v54 }
 0x104   :  { %1946 = vmatmul.mubr.bf16.gmra.mrb[24].mxu0 %v4181_v55  ;;  %2398 = vmatmul.mubr.bf16.gmra.mrb[24].mxu1 %v4181_v55 }
 0x105   :  { %1955 = vmatprep.mubr.bf16.mxu0 %v4182_v56  ;;  %2407 = vmatprep.mubr.bf16.mxu1 %v4182_v56 }
 0x10c   :  { %1956 = vmatmul.mubr.bf16.gmra.mrb[28].mxu0 %v4184_v57  ;;  %2408 = vmatmul.mubr.bf16.gmra.mrb[28].mxu1 %v4184_v57 }
 0x10d   :  { %1998 = vmatprep.mubr.bf16.mxu0 %v4276_v58  ;;  %2450 = vmatprep.mubr.bf16.mxu1 %v4276_v58 }
 0x114   :  { %3373 = vmatmul.mubr.msk.bf16.vlgmr.msra.gmra.mrb[0].mxu0 %vm1602_vm0, %v4185_v59  ;;  %3381 = vmatmul.mubr.msk.bf16.vlgmr.msra.gmra.mrb[0].mxu1 %vm1602_vm0, %v4185_v59 }
 0x115   :  { %2008 = vmatprep.mubr.bf16.mxu0 %v4276_v58  ;;  %2460 = vmatprep.mubr.bf16.mxu1 %v4276_v58 }
 0x116   :  { %3423 = vmatpush3.bf16.msra.mxu0 %v4194_v60  ;;  %3487 = vmatpush3.bf16.msra.mxu1 %v4196_v61 }
 0x117   :  { %3424 = vmatprep.subr.bf16.mxu0 %v4197_v62  ;;  %3488 = vmatprep.subr.bf16.mxu1 %v4199_v63 }
 0x11a   :  { %3425 = vmatpush3.bf16.msra.mxu0 %v4198_v0  ;;  %3489 = vmatpush3.bf16.msra.mxu1 %v4200_v1 }
 0x11b   :  { %3426 = vmatprep.subr.bf16.mxu0 %v4201_v2  ;;  %3490 = vmatprep.subr.bf16.mxu1 %v4203_v3 }
 0x11c   :  { %3374 = vmatmul.mubr.msk.bf16.gmra.mrb[4].mxu0 %vm1602_vm0, %v4186_v4  ;;  %3382 = vmatmul.mubr.msk.bf16.gmra.mrb[4].mxu1 %vm1602_vm0, %v4186_v4 }
 0x11d   :  { %2018 = vmatprep.mubr.bf16.mxu0 %v4276_v58  ;;  %2470 = vmatprep.mubr.bf16.mxu1 %v4276_v58 }
 0x11e   :  { %3427 = vmatpush3.bf16.msra.mxu0 %v4202_v5  ;;  %3491 = vmatpush3.bf16.msra.mxu1 %v4204_v6 }
 0x11f   :  { %3428 = vmatprep.subr.bf16.mxu0 %v4205_v7  ;;  %3492 = vmatprep.subr.bf16.mxu1 %v4207_v8 }
 0x122   :  { %3429 = vmatpush3.bf16.msra.mxu0 %v4206_v9  ;;  %3493 = vmatpush3.bf16.msra.mxu1 %v4208_v10 }
 0x123   :  { %3430 = vmatprep.subr.bf16.mxu0 %v4209_v11  ;;  %3494 = vmatprep.subr.bf16.mxu1 %v4211_v12 }
 0x124   :  { %3375 = vmatmul.mubr.msk.bf16.gmra.mrb[8].mxu0 %vm1602_vm0, %v4187_v13  ;;  %3383 = vmatmul.mubr.msk.bf16.gmra.mrb[8].mxu1 %vm1602_vm0, %v4187_v13 }
 0x125   :  { %2028 = vmatprep.mubr.bf16.mxu0 %v4276_v58  ;;  %2480 = vmatprep.mubr.bf16.mxu1 %v4276_v58 }
 0x126   :  { %3431 = vmatpush3.bf16.msra.mxu0 %v4210_v14  ;;  %3495 = vmatpush3.bf16.msra.mxu1 %v4212_v15 }
 0x127   :  { %3432 = vmatprep.subr.bf16.mxu0 %v4213_v16  ;;  %3496 = vmatprep.subr.bf16.mxu1 %v4215_v17 }
 0x12a   :  { %3433 = vmatpush3.bf16.msra.mxu0 %v4214_v18  ;;  %3497 = vmatpush3.bf16.msra.mxu1 %v4216_v19 }
 0x12b   :  { %3434 = vmatprep.subr.bf16.mxu0 %v4217_v20  ;;  %3498 = vmatprep.subr.bf16.mxu1 %v4219_v21 }
 0x12c   :  { %3376 = vmatmul.mubr.msk.bf16.gmra.mrb[12].mxu0 %vm1602_vm0, %v4188_v22  ;;  %3384 = vmatmul.mubr.msk.bf16.gmra.mrb[12].mxu1 %vm1602_vm0, %v4188_v22 }
 0x12d   :  { %2038 = vmatprep.mubr.bf16.mxu0 %v4276_v58  ;;  %2490 = vmatprep.mubr.bf16.mxu1 %v4276_v58 }
 0x12e   :  { %3435 = vmatpush3.bf16.msra.mxu0 %v4218_v23  ;;  %3499 = vmatpush3.bf16.msra.mxu1 %v4220_v24 }
 0x12f   :  { %3436 = vmatprep.subr.bf16.mxu0 %v4221_v29  ;;  %3500 = vmatprep.subr.bf16.mxu1 %v4223_v30 }
 0x132   :  { %3437 = vmatpush3.bf16.msra.mxu0 %v4222_v31  ;;  %3501 = vmatpush3.bf16.msra.mxu1 %v4224_v32 }
 0x134   :  { %3377 = vmatmul.mubr.msk.bf16.gmra.mrb[16].mxu0 %vm1602_vm0, %v4189_v25  ;;  %3385 = vmatmul.mubr.msk.bf16.gmra.mrb[16].mxu1 %vm1602_vm0, %v4189_v25 }
 0x135   :  { %2048 = vmatprep.mubr.bf16.mxu0 %v4276_v58  ;;  %2500 = vmatprep.mubr.bf16.mxu1 %v4276_v58 }
 0x13c   :  { %3378 = vmatmul.mubr.msk.bf16.gmra.mrb[20].mxu0 %vm1602_vm0, %v4190_v26  ;;  %3386 = vmatmul.mubr.msk.bf16.gmra.mrb[20].mxu1 %vm1602_vm0, %v4190_v26 }
 0x13d   :  { %2058 = vmatprep.mubr.bf16.mxu0 %v4276_v58  ;;  %2510 = vmatprep.mubr.bf16.mxu1 %v4276_v58 }
 0x144   :  { %3379 = vmatmul.mubr.msk.bf16.gmra.mrb[24].mxu0 %vm1602_vm0, %v4191_v27  ;;  %3387 = vmatmul.mubr.msk.bf16.gmra.mrb[24].mxu1 %vm1602_vm0, %v4191_v27 }
 0x145   :  { %2068 = vmatprep.mubr.bf16.mxu0 %v4276_v58  ;;  %2520 = vmatprep.mubr.bf16.mxu1 %v4276_v58 }
 0x14c   :  { %3380 = vmatmul.mubr.msk.bf16.gmra.mrb[28].mxu0 %vm1602_vm0, %v4192_v28  ;;  %3388 = vmatmul.mubr.msk.bf16.gmra.mrb[28].mxu1 %vm1602_vm0, %v4192_v28 }
 0x1e7   :  { %v2000_v44 = vpop.f32.mrb[0].mxu0  ;;  %v2452_v45 = vpop.f32.mrb[0].mxu1 }
 0x1e8   :  { %v3550_v46 = vadd.f32 %v2000_v44, %v4621_v40  ;;  %v3582_v47 = vadd.f32 %v2452_v45, %v4623_v41  ;;  %v2002_v48 = vpop.f32.mrb[1].mxu0  ;;  %v2454_v49 = vpop.f32.mrb[1].mxu1 }
 0x1e9   :  { %v3551_v50 = vadd.f32 %v2002_v48, %v4625_v42  ;;  %v3583_v51 = vadd.f32 %v2454_v49, %v4627_v43  ;;  %v2004_v52 = vpop.f32.mrb[2].mxu0  ;;  %v2456_v53 = vpop.f32.mrb[2].mxu1 }
 0x1ea   :  { %v3552_v54 = vadd.f32 %v2004_v52, %v4621_v40  ;;  %v3584_v55 = vadd.f32 %v2456_v53, %v4623_v41  ;;  %v2006_v56 = vpop.f32.mrb[3].mxu0  ;;  %v2458_v57 = vpop.f32.mrb[3].mxu1  ;;  %v2531_v60 = vmax.f32 %v3550_v46, 0.0  ;;  %v2533_v61 = vmax.f32 %v3582_v47, 0.0 }
 0x1eb   :  { %v3553_v58 = vadd.f32 %v2006_v56, %v4625_v42  ;;  %v3585_v59 = vadd.f32 %v2458_v57, %v4627_v43  ;;  %v2532_v0 = vmax.f32 %v3551_v50, 0.0  ;;  %v2534_v1 = vmax.f32 %v3583_v51, 0.0 }
 0x1ec   :  { %v2535_v62 = vmax.f32 %v3552_v54, 0.0  ;;  %v2537_v63 = vmax.f32 %v3584_v55, 0.0 }
 0x1ed   :  { %v2536_v2 = vmax.f32 %v3553_v58, 0.0  ;;  %v2538_v3 = vmax.f32 %v3585_v59, 0.0 }
 0x1ee   :  { %v2595_v4 = vpack.c.bf16 %v2535_v62, %v2531_v60  ;;  %v2597_v5 = vpack.c.bf16 %v2537_v63, %v2533_v61 }
 0x1ef   :  { %v2596_v6 = vpack.c.bf16 %v2536_v2, %v2532_v0  ;;  %v2598_v7 = vpack.c.bf16 %v2538_v3, %v2534_v1  ;;  %v2010_v8 = vpop.f32.mrb[4].mxu0  ;;  %v2462_v9 = vpop.f32.mrb[4].mxu1 }
 0x1f0   :  { %v3554_v10 = vadd.f32 %v2010_v8, %v4621_v40  ;;  %v3586_v11 = vadd.f32 %v2462_v9, %v4623_v41  ;;  %v2012_v12 = vpop.f32.mrb[5].mxu0  ;;  %v2464_v13 = vpop.f32.mrb[5].mxu1 }
 0x1f1   :  { %v3555_v14 = vadd.f32 %v2012_v12, %v4625_v42  ;;  %v3587_v15 = vadd.f32 %v2464_v13, %v4627_v43  ;;  %v2014_v16 = vpop.f32.mrb[6].mxu0  ;;  %v2466_v17 = vpop.f32.mrb[6].mxu1  ;;  %2922 = vmatprep.mubr.bf16.mxu0 %v2596_v6  ;;  %3019 = vmatprep.mubr.bf16.mxu1 %v2598_v7 }
 0x1f2   :  { %v3556_v18 = vadd.f32 %v2014_v16, %v4621_v40  ;;  %v3588_v19 = vadd.f32 %v2466_v17, %v4623_v41  ;;  %v2016_v20 = vpop.f32.mrb[7].mxu0  ;;  %v2468_v21 = vpop.f32.mrb[7].mxu1  ;;  %2923 = vmatmul.mubr.bf16.vlgmr.msra.gmra.mrb[32].mxu0 %v2595_v4  ;;  %3020 = vmatmul.mubr.bf16.vlgmr.msra.gmra.mrb[32].mxu1 %v2597_v5  ;;  %v2539_v24 = vmax.f32 %v3554_v10, 0.0  ;;  %v2541_v25 = vmax.f32 %v3586_v11, 0.0 }
 0x1f3   :  { %v3557_v22 = vadd.f32 %v2016_v20, %v4625_v42  ;;  %v3589_v23 = vadd.f32 %v2468_v21, %v4627_v43  ;;  %v2540_v28 = vmax.f32 %v3555_v14, 0.0  ;;  %v2542_v29 = vmax.f32 %v3587_v15, 0.0 }
 0x1f4   :  { %v2543_v26 = vmax.f32 %v3556_v18, 0.0  ;;  %v2545_v27 = vmax.f32 %v3588_v19, 0.0 }
 0x1f5   :  { %v2544_v30 = vmax.f32 %v3557_v22, 0.0  ;;  %v2546_v31 = vmax.f32 %v3589_v23, 0.0 }
 0x1f6   :  { %v2599_v32 = vpack.c.bf16 %v2543_v26, %v2539_v24  ;;  %v2601_v33 = vpack.c.bf16 %v2545_v27, %v2541_v25 }
 0x1f7   :  { %v2600_v34 = vpack.c.bf16 %v2544_v30, %v2540_v28  ;;  %v2602_v35 = vpack.c.bf16 %v2546_v31, %v2542_v29  ;;  %v2020_v36 = vpop.f32.mrb[8].mxu0  ;;  %v2472_v37 = vpop.f32.mrb[8].mxu1 }
 0x1f8   :  { %v3558_v38 = vadd.f32 %v2020_v36, %v4621_v40  ;;  %v3590_v39 = vadd.f32 %v2472_v37, %v4623_v41  ;;  %v2022_v44 = vpop.f32.mrb[9].mxu0  ;;  %v2474_v45 = vpop.f32.mrb[9].mxu1 }
 0x1f9   :  { %v3559_v46 = vadd.f32 %v2022_v44, %v4625_v42  ;;  %v3591_v47 = vadd.f32 %v2474_v45, %v4627_v43  ;;  %v2024_v48 = vpop.f32.mrb[10].mxu0  ;;  %v2476_v49 = vpop.f32.mrb[10].mxu1  ;;  %2930 = vmatprep.mubr.bf16.mxu0 %v2600_v34  ;;  %3027 = vmatprep.mubr.bf16.mxu1 %v2602_v35 }
 0x1fa   :  { %v3560_v50 = vadd.f32 %v2024_v48, %v4621_v40  ;;  %v3592_v51 = vadd.f32 %v2476_v49, %v4623_v41  ;;  %v2026_v52 = vpop.f32.mrb[11].mxu0  ;;  %v2478_v53 = vpop.f32.mrb[11].mxu1  ;;  %2931 = vmatmul.mubr.bf16.gmra.mrb[36].mxu0 %v2599_v32  ;;  %3028 = vmatmul.mubr.bf16.gmra.mrb[36].mxu1 %v2601_v33  ;;  %v2547_v56 = vmax.f32 %v3558_v38, 0.0  ;;  %v2549_v57 = vmax.f32 %v3590_v39, 0.0 }
 0x1fb   :  { %v3561_v54 = vadd.f32 %v2026_v52, %v4625_v42  ;;  %v3593_v55 = vadd.f32 %v2478_v53, %v4627_v43  ;;  %v2548_v60 = vmax.f32 %v3559_v46, 0.0  ;;  %v2550_v61 = vmax.f32 %v3591_v47, 0.0 }
 0x1fc   :  { %v2551_v58 = vmax.f32 %v3560_v50, 0.0  ;;  %v2553_v59 = vmax.f32 %v3592_v51, 0.0 }
 0x1fd   :  { %v2552_v62 = vmax.f32 %v3561_v54, 0.0  ;;  %v2554_v63 = vmax.f32 %v3593_v55, 0.0 }
 0x1fe   :  { %v2603_v0 = vpack.c.bf16 %v2551_v58, %v2547_v56  ;;  %v2605_v1 = vpack.c.bf16 %v2553_v59, %v2549_v57 }
 0x1ff   :  { %v2604_v2 = vpack.c.bf16 %v2552_v62, %v2548_v60  ;;  %v2606_v3 = vpack.c.bf16 %v2554_v63, %v2550_v61  ;;  %v2030_v4 = vpop.f32.mrb[12].mxu0  ;;  %v2482_v5 = vpop.f32.mrb[12].mxu1 }
 0x200   :  { %v3562_v6 = vadd.f32 %v2030_v4, %v4621_v40  ;;  %v3594_v7 = vadd.f32 %v2482_v5, %v4623_v41  ;;  %v2032_v8 = vpop.f32.mrb[13].mxu0  ;;  %v2484_v9 = vpop.f32.mrb[13].mxu1 }
 0x201   :  { %v3563_v10 = vadd.f32 %v2032_v8, %v4625_v42  ;;  %v3595_v11 = vadd.f32 %v2484_v9, %v4627_v43  ;;  %v2034_v12 = vpop.f32.mrb[14].mxu0  ;;  %v2486_v13 = vpop.f32.mrb[14].mxu1  ;;  %2938 = vmatprep.mubr.bf16.mxu0 %v2604_v2  ;;  %3035 = vmatprep.mubr.bf16.mxu1 %v2606_v3 }
 0x202   :  { %v3564_v14 = vadd.f32 %v2034_v12, %v4621_v40  ;;  %v3596_v15 = vadd.f32 %v2486_v13, %v4623_v41  ;;  %v2036_v16 = vpop.f32.mrb[15].mxu0  ;;  %v2488_v17 = vpop.f32.mrb[15].mxu1  ;;  %2939 = vmatmul.mubr.bf16.gmra.mrb[40].mxu0 %v2603_v0  ;;  %3036 = vmatmul.mubr.bf16.gmra.mrb[40].mxu1 %v2605_v1  ;;  %v2555_v20 = vmax.f32 %v3562_v6, 0.0  ;;  %v2557_v21 = vmax.f32 %v3594_v7, 0.0 }
 0x203   :  { %v3565_v18 = vadd.f32 %v2036_v16, %v4625_v42  ;;  %v3597_v19 = vadd.f32 %v2488_v17, %v4627_v43  ;;  %v2556_v24 = vmax.f32 %v3563_v10, 0.0  ;;  %v2558_v25 = vmax.f32 %v3595_v11, 0.0 }
 0x204   :  { %v2559_v22 = vmax.f32 %v3564_v14, 0.0  ;;  %v2561_v23 = vmax.f32 %v3596_v15, 0.0 }
 0x205   :  { %v2560_v26 = vmax.f32 %v3565_v18, 0.0  ;;  %v2562_v27 = vmax.f32 %v3597_v19, 0.0 }
 0x206   :  { %v2607_v28 = vpack.c.bf16 %v2559_v22, %v2555_v20  ;;  %v2609_v29 = vpack.c.bf16 %v2561_v23, %v2557_v21 }
 0x207   :  { %v2608_v30 = vpack.c.bf16 %v2560_v26, %v2556_v24  ;;  %v2610_v31 = vpack.c.bf16 %v2562_v27, %v2558_v25  ;;  %v2040_v32 = vpop.f32.mrb[16].mxu0  ;;  %v2492_v33 = vpop.f32.mrb[16].mxu1 }
 0x208   :  { %v3566_v34 = vadd.f32 %v2040_v32, %v4621_v40  ;;  %v3598_v35 = vadd.f32 %v2492_v33, %v4623_v41  ;;  %v2042_v36 = vpop.f32.mrb[17].mxu0  ;;  %v2494_v37 = vpop.f32.mrb[17].mxu1 }
 0x209   :  { %v3567_v38 = vadd.f32 %v2042_v36, %v4625_v42  ;;  %v3599_v39 = vadd.f32 %v2494_v37, %v4627_v43  ;;  %v2044_v44 = vpop.f32.mrb[18].mxu0  ;;  %v2496_v45 = vpop.f32.mrb[18].mxu1  ;;  %2946 = vmatprep.mubr.bf16.mxu0 %v2608_v30  ;;  %3043 = vmatprep.mubr.bf16.mxu1 %v2610_v31 }
 0x20a   :  { %v3568_v46 = vadd.f32 %v2044_v44, %v4621_v40  ;;  %v3600_v47 = vadd.f32 %v2496_v45, %v4623_v41  ;;  %v2046_v48 = vpop.f32.mrb[19].mxu0  ;;  %v2498_v49 = vpop.f32.mrb[19].mxu1  ;;  %2947 = vmatmul.mubr.bf16.gmra.mrb[44].mxu0 %v2607_v28  ;;  %3044 = vmatmul.mubr.bf16.gmra.mrb[44].mxu1 %v2609_v29  ;;  %v2563_v52 = vmax.f32 %v3566_v34, 0.0  ;;  %v2565_v53 = vmax.f32 %v3598_v35, 0.0 }
 0x20b   :  { %v3569_v50 = vadd.f32 %v2046_v48, %v4625_v42  ;;  %v3601_v51 = vadd.f32 %v2498_v49, %v4627_v43  ;;  %v2564_v56 = vmax.f32 %v3567_v38, 0.0  ;;  %v2566_v57 = vmax.f32 %v3599_v39, 0.0 }
 0x20c   :  { %v2567_v54 = vmax.f32 %v3568_v46, 0.0  ;;  %v2569_v55 = vmax.f32 %v3600_v47, 0.0 }
 0x20d   :  { %v2568_v58 = vmax.f32 %v3569_v50, 0.0  ;;  %v2570_v59 = vmax.f32 %v3601_v51, 0.0 }
 0x20e   :  { %v2611_v60 = vpack.c.bf16 %v2567_v54, %v2563_v52  ;;  %v2613_v61 = vpack.c.bf16 %v2569_v55, %v2565_v53 }
 0x20f   :  { %v2612_v62 = vpack.c.bf16 %v2568_v58, %v2564_v56  ;;  %v2614_v63 = vpack.c.bf16 %v2570_v59, %v2566_v57  ;;  %v2050_v0 = vpop.f32.mrb[20].mxu0  ;;  %v2502_v1 = vpop.f32.mrb[20].mxu1 }
 0x210   :  { %v3570_v2 = vadd.f32 %v2050_v0, %v4621_v40  ;;  %v3602_v3 = vadd.f32 %v2502_v1, %v4623_v41  ;;  %v2052_v4 = vpop.f32.mrb[21].mxu0  ;;  %v2504_v5 = vpop.f32.mrb[21].mxu1 }
 0x211   :  { %v3571_v6 = vadd.f32 %v2052_v4, %v4625_v42  ;;  %v3603_v7 = vadd.f32 %v2504_v5, %v4627_v43  ;;  %v2054_v8 = vpop.f32.mrb[22].mxu0  ;;  %v2506_v9 = vpop.f32.mrb[22].mxu1  ;;  %2954 = vmatprep.mubr.bf16.mxu0 %v2612_v62  ;;  %3051 = vmatprep.mubr.bf16.mxu1 %v2614_v63 }
 0x212   :  { %v3572_v10 = vadd.f32 %v2054_v8, %v4621_v40  ;;  %v3604_v11 = vadd.f32 %v2506_v9, %v4623_v41  ;;  %v2056_v12 = vpop.f32.mrb[23].mxu0  ;;  %v2508_v13 = vpop.f32.mrb[23].mxu1  ;;  %2955 = vmatmul.mubr.bf16.gmra.mrb[48].mxu0 %v2611_v60  ;;  %3052 = vmatmul.mubr.bf16.gmra.mrb[48].mxu1 %v2613_v61  ;;  %v2571_v16 = vmax.f32 %v3570_v2, 0.0  ;;  %v2573_v17 = vmax.f32 %v3602_v3, 0.0 }
 0x213   :  { %v3573_v14 = vadd.f32 %v2056_v12, %v4625_v42  ;;  %v3605_v15 = vadd.f32 %v2508_v13, %v4627_v43  ;;  %v2572_v20 = vmax.f32 %v3571_v6, 0.0  ;;  %v2574_v21 = vmax.f32 %v3603_v7, 0.0 }
 0x214   :  { %v2575_v18 = vmax.f32 %v3572_v10, 0.0  ;;  %v2577_v19 = vmax.f32 %v3604_v11, 0.0 }
 0x215   :  { %v2576_v22 = vmax.f32 %v3573_v14, 0.0  ;;  %v2578_v23 = vmax.f32 %v3605_v15, 0.0 }
 0x216   :  { %v2615_v24 = vpack.c.bf16 %v2575_v18, %v2571_v16  ;;  %v2617_v25 = vpack.c.bf16 %v2577_v19, %v2573_v17 }
 0x217   :  { %v2616_v26 = vpack.c.bf16 %v2576_v22, %v2572_v20  ;;  %v2618_v27 = vpack.c.bf16 %v2578_v23, %v2574_v21  ;;  %v2060_v28 = vpop.f32.mrb[24].mxu0  ;;  %v2512_v29 = vpop.f32.mrb[24].mxu1 }
 0x218   :  { %v3574_v30 = vadd.f32 %v2060_v28, %v4621_v40  ;;  %v3606_v31 = vadd.f32 %v2512_v29, %v4623_v41  ;;  %v2062_v32 = vpop.f32.mrb[25].mxu0  ;;  %v2514_v33 = vpop.f32.mrb[25].mxu1 }
 0x219   :  { %v3575_v34 = vadd.f32 %v2062_v32, %v4625_v42  ;;  %v3607_v35 = vadd.f32 %v2514_v33, %v4627_v43  ;;  %v2064_v36 = vpop.f32.mrb[26].mxu0  ;;  %v2516_v37 = vpop.f32.mrb[26].mxu1  ;;  %2962 = vmatprep.mubr.bf16.mxu0 %v2616_v26  ;;  %3059 = vmatprep.mubr.bf16.mxu1 %v2618_v27 }
 0x21a   :  { %v3576_v38 = vadd.f32 %v2064_v36, %v4621_v40  ;;  %v3608_v39 = vadd.f32 %v2516_v37, %v4623_v41  ;;  %v2066_v44 = vpop.f32.mrb[27].mxu0  ;;  %v2518_v45 = vpop.f32.mrb[27].mxu1  ;;  %2963 = vmatmul.mubr.bf16.gmra.mrb[52].mxu0 %v2615_v24  ;;  %3060 = vmatmul.mubr.bf16.gmra.mrb[52].mxu1 %v2617_v25  ;;  %v2579_v48 = vmax.f32 %v3574_v30, 0.0  ;;  %v2581_v49 = vmax.f32 %v3606_v31, 0.0 }
 0x21b   :  { %v3577_v46 = vadd.f32 %v2066_v44, %v4625_v42  ;;  %v3609_v47 = vadd.f32 %v2518_v45, %v4627_v43  ;;  %v2580_v52 = vmax.f32 %v3575_v34, 0.0  ;;  %v2582_v53 = vmax.f32 %v3607_v35, 0.0 }
 0x21c   :  { %v2583_v50 = vmax.f32 %v3576_v38, 0.0  ;;  %v2585_v51 = vmax.f32 %v3608_v39, 0.0 }
 0x21d   :  { %v2584_v54 = vmax.f32 %v3577_v46, 0.0  ;;  %v2586_v55 = vmax.f32 %v3609_v47, 0.0 }
 0x21e   :  { %v2619_v56 = vpack.c.bf16 %v2583_v50, %v2579_v48  ;;  %v2621_v57 = vpack.c.bf16 %v2585_v51, %v2581_v49 }
 0x21f   :  { %v2620_v58 = vpack.c.bf16 %v2584_v54, %v2580_v52  ;;  %v2622_v59 = vpack.c.bf16 %v2586_v55, %v2582_v53  ;;  %v2070_v60 = vpop.f32.mrb[28].mxu0  ;;  %v2522_v61 = vpop.f32.mrb[28].mxu1 }
 0x220   :  { %v3578_v62 = vadd.f32 %v2070_v60, %v4621_v40  ;;  %v3610_v63 = vadd.f32 %v2522_v61, %v4623_v41  ;;  %v2072_v0 = vpop.f32.mrb[29].mxu0  ;;  %v2524_v1 = vpop.f32.mrb[29].mxu1 }
 0x221   :  { %v3579_v2 = vadd.f32 %v2072_v0, %v4625_v42  ;;  %v3611_v3 = vadd.f32 %v2524_v1, %v4627_v43  ;;  %v2074_v4 = vpop.f32.mrb[30].mxu0  ;;  %v2526_v5 = vpop.f32.mrb[30].mxu1  ;;  %2970 = vmatprep.mubr.bf16.mxu0 %v2620_v58  ;;  %3067 = vmatprep.mubr.bf16.mxu1 %v2622_v59 }
 0x222   :  { %v3580_v6 = vadd.f32 %v2074_v4, %v4621_v40  ;;  %v3612_v7 = vadd.f32 %v2526_v5, %v4623_v41  ;;  %v2076_v8 = vpop.f32.mrb[31].mxu0  ;;  %v2528_v9 = vpop.f32.mrb[31].mxu1  ;;  %2971 = vmatmul.mubr.bf16.gmra.mrb[56].mxu0 %v2619_v56  ;;  %3068 = vmatmul.mubr.bf16.gmra.mrb[56].mxu1 %v2621_v57  ;;  %v2587_v12 = vmax.f32 %v3578_v62, 0.0  ;;  %v2589_v13 = vmax.f32 %v3610_v63, 0.0 }
 0x223   :  { %v3581_v10 = vadd.f32 %v2076_v8, %v4625_v42  ;;  %v3613_v11 = vadd.f32 %v2528_v9, %v4627_v43  ;;  %v2588_v16 = vmax.f32 %v3579_v2, 0.0  ;;  %v2590_v17 = vmax.f32 %v3611_v3, 0.0  ;;  %v4696_v43 = vld [vmem:[%s4730_s4] ss:$0 sm:$0xff]  ;;  %s4277_s4 = smov [#allocation5]  }
 0x224   :  { %v2591_v14 = vmax.f32 %v3580_v6, 0.0  ;;  %v2593_v15 = vmax.f32 %v3612_v7, 0.0  ;;  %s3105_s27 = sshll.u32 %s4277_s4, 4  ;;  %s3106_s27 = int_to_ptr.vmem [resolvable:$true] %s3105_s27 }
 0x225   :  { %v2592_v18 = vmax.f32 %v3581_v10, 0.0  ;;  %v2594_v19 = vmax.f32 %v3613_v11, 0.0  ;;  %s4247_s28 = scalar_lea.vmem %s3106_s27, 2048  ;;  %p4252_p9 = scmp.lt.s32.totalorder %s3106_s27, %s3106_s27 }
 0x226   :  { %v2623_v20 = vpack.c.bf16 %v2591_v14, %v2587_v12  ;;  %v2625_v40 = vpack.c.bf16 %v2593_v15, %v2589_v13  ;;  %p4248_p8 = scmp.ne.s32.totalorder %s3106_s27, %s4247_s28  ;;  %p4253_p10 = scmp.lt.s32.totalorder %s4247_s28, %s4247_s28 }
 0x227   :  { %v2624_v21 = vpack.c.bf16 %v2592_v18, %v2588_v16  ;;  %v2626_v41 = vpack.c.bf16 %v2594_v19, %v2590_v17 }
 0x228   :  { %p4254_p11 = por %p4253_p10, %p4252_p9 }
 0x229   :  { %2978 = vmatprep.mubr.bf16.mxu0 %v2624_v21  ;;  %3075 = vmatprep.mubr.bf16.mxu1 %v2626_v41 }
 0x22a   :  { %2979 = vmatmul.mubr.bf16.gmra.mrb[60].mxu0 %v2623_v20  ;;  %3076 = vmatmul.mubr.bf16.gmra.mrb[60].mxu1 %v2625_v40  ;;  %p4255_p12 = pnand %p4254_p11, %p4248_p8 }
 0x2c5   :  { %v3438_v22 = vpop.f32.mrb[32].mxu0  ;;  %v3502_v42 = vpop.f32.mrb[32].mxu1 }
 0x2c6   :  { %v3439_v23 = vpop.f32.mrb[33].mxu0  ;;  %v3503_v24 = vpop.f32.mrb[33].mxu1 }
 0x2c7   :  { %v3440_v25 = vadd.f32 %v3439_v23, %v3438_v22  ;;  %v3504_v26 = vadd.f32 %v3503_v24, %v3502_v42  ;;  %v3441_v27 = vpop.f32.mrb[34].mxu0  ;;  %v3505_v28 = vpop.f32.mrb[34].mxu1 }
 0x2c8   :  { %v3442_v29 = vpop.f32.mrb[35].mxu0  ;;  %v3506_v30 = vpop.f32.mrb[35].mxu1 }
 0x2c9   :  { %v2925_v31 = vadd.f32 %v3440_v25, %v4696_v43  ;;  %v3443_v32 = vadd.f32 %v3442_v29, %v3441_v27  ;;  %v3507_v33 = vadd.f32 %v3506_v30, %v3505_v28 }
 0x2cb   :  { %v3022_v34 = vadd.f32 %v3504_v26, %v2925_v31  ;;  %v2928_v35 = vadd.f32 %v3443_v32, %v4696_v43 }
 0x2cd   :  { %3084 = vst [vmem:[#allocation5] sm:$0xff] %v3022_v34  ;;  %v3025_v36 = vadd.f32 %v3507_v33, %v2928_v35  ;;  %v3444_v37 = vpop.f32.mrb[36].mxu0  ;;  %v3508_v38 = vpop.f32.mrb[36].mxu1 }
 0x2ce   :  { %v3445_v39 = vpop.f32.mrb[37].mxu0  ;;  %v3509_v44 = vpop.f32.mrb[37].mxu1 }
 0x2cf   :  { %3085 = vst [vmem:[#allocation5 + $0x8] sm:$0xff] %v3025_v36  ;;  %v3446_v45 = vadd.f32 %v3445_v39, %v3444_v37  ;;  %v3510_v46 = vadd.f32 %v3509_v44, %v3508_v38  ;;  %v3447_v47 = vpop.f32.mrb[38].mxu0  ;;  %v3511_v48 = vpop.f32.mrb[38].mxu1 }
 0x2d0   :  { %v3448_v49 = vpop.f32.mrb[39].mxu0  ;;  %v3512_v50 = vpop.f32.mrb[39].mxu1 }
 0x2d1   :  { %v2933_v51 = vadd.f32 %v3446_v45, %v4696_v43  ;;  %v3449_v52 = vadd.f32 %v3448_v49, %v3447_v47  ;;  %v3513_v53 = vadd.f32 %v3512_v50, %v3511_v48 }
 0x2d3   :  { %v3030_v54 = vadd.f32 %v3510_v46, %v2933_v51  ;;  %v2936_v55 = vadd.f32 %v3449_v52, %v4696_v43 }
 0x2d5   :  { %3086 = vst [vmem:[#allocation5 + $0x10] sm:$0xff] %v3030_v54  ;;  %v3033_v56 = vadd.f32 %v3513_v53, %v2936_v55  ;;  %v3450_v57 = vpop.f32.mrb[40].mxu0  ;;  %v3514_v58 = vpop.f32.mrb[40].mxu1 }
 0x2d6   :  { %v3451_v59 = vpop.f32.mrb[41].mxu0  ;;  %v3515_v60 = vpop.f32.mrb[41].mxu1 }
 0x2d7   :  { %3087 = vst [vmem:[#allocation5 + $0x18] sm:$0xff] %v3033_v56  ;;  %v3452_v61 = vadd.f32 %v3451_v59, %v3450_v57  ;;  %v3516_v62 = vadd.f32 %v3515_v60, %v3514_v58  ;;  %v3453_v63 = vpop.f32.mrb[42].mxu0  ;;  %v3517_v0 = vpop.f32.mrb[42].mxu1 }
 0x2d8   :  { %v3454_v1 = vpop.f32.mrb[43].mxu0  ;;  %v3518_v2 = vpop.f32.mrb[43].mxu1 }
 0x2d9   :  { %v2941_v3 = vadd.f32 %v3452_v61, %v4696_v43  ;;  %v3455_v4 = vadd.f32 %v3454_v1, %v3453_v63  ;;  %v3519_v5 = vadd.f32 %v3518_v2, %v3517_v0 }
 0x2db   :  { %v3038_v6 = vadd.f32 %v3516_v62, %v2941_v3  ;;  %v2944_v7 = vadd.f32 %v3455_v4, %v4696_v43 }
 0x2dd   :  { %3088 = vst [vmem:[#allocation5 + $0x20] sm:$0xff] %v3038_v6  ;;  %v3041_v8 = vadd.f32 %v3519_v5, %v2944_v7  ;;  %v3456_v9 = vpop.f32.mrb[44].mxu0  ;;  %v3520_v10 = vpop.f32.mrb[44].mxu1 }
 0x2de   :  { %v3457_v11 = vpop.f32.mrb[45].mxu0  ;;  %v3521_v12 = vpop.f32.mrb[45].mxu1 }
 0x2df   :  { %3089 = vst [vmem:[#allocation5 + $0x28] sm:$0xff] %v3041_v8  ;;  %v3458_v13 = vadd.f32 %v3457_v11, %v3456_v9  ;;  %v3522_v14 = vadd.f32 %v3521_v12, %v3520_v10  ;;  %v3459_v15 = vpop.f32.mrb[46].mxu0  ;;  %v3523_v16 = vpop.f32.mrb[46].mxu1 }
 0x2e0   :  { %v3460_v17 = vpop.f32.mrb[47].mxu0  ;;  %v3524_v18 = vpop.f32.mrb[47].mxu1 }
 0x2e1   :  { %v2949_v19 = vadd.f32 %v3458_v13, %v4696_v43  ;;  %v3461_v20 = vadd.f32 %v3460_v17, %v3459_v15  ;;  %v3525_v40 = vadd.f32 %v3524_v18, %v3523_v16 }
 0x2e3   :  { %v3046_v21 = vadd.f32 %v3522_v14, %v2949_v19  ;;  %v2952_v41 = vadd.f32 %v3461_v20, %v4696_v43 }
 0x2e5   :  { %3090 = vst [vmem:[#allocation5 + $0x30] sm:$0xff] %v3046_v21  ;;  %v3049_v22 = vadd.f32 %v3525_v40, %v2952_v41  ;;  %v3462_v42 = vpop.f32.mrb[48].mxu0  ;;  %v3526_v23 = vpop.f32.mrb[48].mxu1 }
 0x2e6   :  { %v3463_v24 = vpop.f32.mrb[49].mxu0  ;;  %v3527_v25 = vpop.f32.mrb[49].mxu1 }
 0x2e7   :  { %3091 = vst [vmem:[#allocation5 + $0x38] sm:$0xff] %v3049_v22  ;;  %v3464_v26 = vadd.f32 %v3463_v24, %v3462_v42  ;;  %v3528_v27 = vadd.f32 %v3527_v25, %v3526_v23  ;;  %v3465_v28 = vpop.f32.mrb[50].mxu0  ;;  %v3529_v29 = vpop.f32.mrb[50].mxu1 }
 0x2e8   :  { %v3466_v30 = vpop.f32.mrb[51].mxu0  ;;  %v3530_v31 = vpop.f32.mrb[51].mxu1 }
 0x2e9   :  { %v2957_v32 = vadd.f32 %v3464_v26, %v4696_v43  ;;  %v3467_v33 = vadd.f32 %v3466_v30, %v3465_v28  ;;  %v3531_v34 = vadd.f32 %v3530_v31, %v3529_v29 }
 0x2eb   :  { %v3054_v35 = vadd.f32 %v3528_v27, %v2957_v32  ;;  %v2960_v36 = vadd.f32 %v3467_v33, %v4696_v43 }
 0x2ed   :  { %3092 = vst [vmem:[#allocation5 + $0x40] sm:$0xff] %v3054_v35  ;;  %v3057_v37 = vadd.f32 %v3531_v34, %v2960_v36  ;;  %v3468_v38 = vpop.f32.mrb[52].mxu0  ;;  %v3532_v39 = vpop.f32.mrb[52].mxu1 }
 0x2ee   :  { %v3469_v44 = vpop.f32.mrb[53].mxu0  ;;  %v3533_v45 = vpop.f32.mrb[53].mxu1 }
 0x2ef   :  { %3093 = vst [vmem:[#allocation5 + $0x48] sm:$0xff] %v3057_v37  ;;  %v3470_v46 = vadd.f32 %v3469_v44, %v3468_v38  ;;  %v3534_v47 = vadd.f32 %v3533_v45, %v3532_v39  ;;  %v3471_v48 = vpop.f32.mrb[54].mxu0  ;;  %v3535_v49 = vpop.f32.mrb[54].mxu1 }
 0x2f0   :  { %v3472_v50 = vpop.f32.mrb[55].mxu0  ;;  %v3536_v51 = vpop.f32.mrb[55].mxu1 }
 0x2f1   :  { %v2965_v52 = vadd.f32 %v3470_v46, %v4696_v43  ;;  %v3473_v53 = vadd.f32 %v3472_v50, %v3471_v48  ;;  %v3537_v54 = vadd.f32 %v3536_v51, %v3535_v49 }
 0x2f3   :  { %v3062_v55 = vadd.f32 %v3534_v47, %v2965_v52  ;;  %v2968_v56 = vadd.f32 %v3473_v53, %v4696_v43 }
 0x2f5   :  { %3094 = vst [vmem:[#allocation5 + $0x50] sm:$0xff] %v3062_v55  ;;  %v3065_v57 = vadd.f32 %v3537_v54, %v2968_v56  ;;  %v3474_v58 = vpop.f32.mrb[56].mxu0  ;;  %v3538_v59 = vpop.f32.mrb[56].mxu1 }
 0x2f6   :  { %v3475_v60 = vpop.f32.mrb[57].mxu0  ;;  %v3539_v61 = vpop.f32.mrb[57].mxu1 }
 0x2f7   :  { %3095 = vst [vmem:[#allocation5 + $0x58] sm:$0xff] %v3065_v57  ;;  %v3476_v62 = vadd.f32 %v3475_v60, %v3474_v58  ;;  %v3540_v63 = vadd.f32 %v3539_v61, %v3538_v59  ;;  %v3477_v0 = vpop.f32.mrb[58].mxu0  ;;  %v3541_v1 = vpop.f32.mrb[58].mxu1 }
 0x2f8   :  { %v3478_v2 = vpop.f32.mrb[59].mxu0  ;;  %v3542_v3 = vpop.f32.mrb[59].mxu1 }
 0x2f9   :  { %v2973_v4 = vadd.f32 %v3476_v62, %v4696_v43  ;;  %v3479_v5 = vadd.f32 %v3478_v2, %v3477_v0  ;;  %v3543_v6 = vadd.f32 %v3542_v3, %v3541_v1 }
 0x2fb   :  { %v3070_v7 = vadd.f32 %v3540_v63, %v2973_v4  ;;  %v2976_v8 = vadd.f32 %v3479_v5, %v4696_v43 }
 0x2fd   :  { %3096 = vst [vmem:[#allocation5 + $0x60] sm:$0xff] %v3070_v7  ;;  %v3073_v9 = vadd.f32 %v3543_v6, %v2976_v8  ;;  %v3480_v10 = vpop.f32.mrb[60].mxu0  ;;  %v3544_v11 = vpop.f32.mrb[60].mxu1 }
 0x2fe   :  { %v3481_v12 = vpop.f32.mrb[61].mxu0  ;;  %v3545_v13 = vpop.f32.mrb[61].mxu1 }
 0x2ff   :  { %3097 = vst [vmem:[#allocation5 + $0x68] sm:$0xff] %v3073_v9  ;;  %v3482_v14 = vadd.f32 %v3481_v12, %v3480_v10  ;;  %v3546_v15 = vadd.f32 %v3545_v13, %v3544_v11  ;;  %v3483_v16 = vpop.f32.mrb[62].mxu0  ;;  %v3547_v17 = vpop.f32.mrb[62].mxu1 }
 0x300   :  { %v3484_v18 = vpop.f32.mrb[63].mxu0  ;;  %v3548_v19 = vpop.f32.mrb[63].mxu1 }
 0x301   :  { %v2981_v20 = vadd.f32 %v3482_v14, %v4696_v43  ;;  %v3485_v40 = vadd.f32 %v3484_v18, %v3483_v16  ;;  %v3549_v21 = vadd.f32 %v3548_v19, %v3547_v17 }
 0x303   :  { %v3078_v41 = vadd.f32 %v3546_v15, %v2981_v20  ;;  %v2984_v22 = vadd.f32 %v3485_v40, %v4696_v43 }
 0x305   :  { %3098 = vst [vmem:[#allocation5 + $0x70] sm:$0xff] %v3078_v41  ;;  %v3081_v42 = vadd.f32 %v3549_v21, %v2984_v22 }
 0x307   :  { %3099 = vst [vmem:[#allocation5 + $0x78] sm:$0xff] %v3081_v42 }
 0x308   :  { %4258 = shalt.err (!%p4255_p12)
}
 0x309   :  { %s4259_s6 = scalar_lea.hbm %s4731_s5, 2048 }
 0x30a   :  { %p4260_p13 = scmp.ne.s32.totalorder %s4731_s5, %s4259_s6  ;;  %p4263_p0 = scmp.lt.u32.totalorder %s4259_s6, %s4731_s5 }
 0x30c   :  { %p4265_p1 = pnand %p4263_p0, %p4260_p13 }
 0x30e   :  { %4268 = shalt.err (!%p4265_p1)
}
 0x30f   :  { %s4278_s10 = smov 128   ;;  %s4279_s11 = smov 8  }
 0x310   :  { %3111 = dma.vmem_to_hbm [thread:$0]  %s3106_s27, 2048, %s4731_s5, [#allocation4], %s4278_s10, %s4278_s10, %s4279_s11  }
 0x311   :  { %4271 = dma.done.wait [#allocation4], 2048  }
 0x312   :  { %4272 = vsyncadd [#allocation4], 4294965248 }
 0x313   :  { %3115 = vsyncpa [#allocation3], 1 }
 0x314   :  { %3116 = vsyncpa [#allocation4], 1 }

</bundles_post_ra>
